<compile_context>
chip_gen: v6e
topology: v6e:2x2x1
jax: 0.10.0
libtpu: 0.0.40
codegen_flags: <defaults>
</compile_context>

<pallas_src>
import functools

import jax
import jax.numpy as jnp
import numpy as np
from jax.experimental import pallas as pl
from jax.experimental.pallas import tpu as pltpu


def _pad_to(v: int, mult: int) -> int:
    return ((v + mult - 1) // mult) * mult


# ---------------------------------------------------------------------------
# Fused 2-layer GCN kernel (no scratch; activations live in registers).
# ---------------------------------------------------------------------------
def fused_gcn_net_kernel(a_ref, x_ref, w1t_ref, w2t_ref, o_ref):
    """o = A @ ( relu(A @ (X @ W1t)) @ W2t ), all matmuls on the MXU.

    a_ref  : (N_p, N_p)     bf16 dense adjacency (lane dim padded to 128)
    x_ref  : (N_p, in_p)    bf16 node features
    w1t_ref: (in_p, hid_p)  bf16 transposed layer-1 weight (zero-padded)
    w2t_ref: (hid_p, out_p) bf16 transposed layer-2 weight (zero-padded)
    o_ref  : (N_p, out_p)   f32 output
    """
    a = a_ref[...]

    # ---- layer 1 (reassociated): h1 = relu(A @ (X @ W1t)) ----
    xw1 = jnp.dot(x_ref[...], w1t_ref[...],
                  preferred_element_type=jnp.float32)            # (N_p, hid_p) f32
    h1 = jnp.dot(a, xw1.astype(jnp.bfloat16),
                 preferred_element_type=jnp.float32)             # (N_p, hid_p) f32
    h1b = jnp.maximum(h1, 0.0).astype(jnp.bfloat16)              # relu, stays in vregs

    # ---- layer 2 (reassociated): out = A @ (h1 @ W2t) ----
    hw2 = jnp.dot(h1b, w2t_ref[...],
                  preferred_element_type=jnp.float32)            # (N_p, out_p) f32
    out = jnp.dot(a, hw2.astype(jnp.bfloat16),
                  preferred_element_type=jnp.float32)            # (N_p, out_p) f32
    o_ref[...] = out.astype(o_ref.dtype)                         # unmasked vst (128 lanes)


def gcn_net_fused(adj_p, feat_p, w1t_p, w2t_p):
    """Run the fused 2-layer GCN on padded, bf16 inputs."""
    n_p, in_p = feat_p.shape
    hid_p = w1t_p.shape[1]
    out_p = w2t_p.shape[1]

    flops = (2 * n_p * in_p * hid_p        # X @ W1t
             + 2 * n_p * n_p * hid_p       # A @ XW1
             + 2 * n_p * hid_p * out_p     # h1 @ W2t
             + 2 * n_p * n_p * out_p)      # A @ HW2
    bytes_accessed = (adj_p.size * 2 + feat_p.size * 2
                      + w1t_p.size * 2 + w2t_p.size * 2
                      + n_p * out_p * 4)

    return pl.pallas_call(
        fused_gcn_net_kernel,
        out_shape=jax.ShapeDtypeStruct((n_p, out_p), jnp.float32),
        grid=(1,),
        in_specs=[
            pl.BlockSpec((n_p, n_p), lambda i: (0, 0)),
            pl.BlockSpec((n_p, in_p), lambda i: (0, 0)),
            pl.BlockSpec((in_p, hid_p), lambda i: (0, 0)),
            pl.BlockSpec((hid_p, out_p), lambda i: (0, 0)),
        ],
        out_specs=pl.BlockSpec((n_p, out_p), lambda i: (0, 0)),
        compiler_params=pltpu.CompilerParams(
            # Single graph => single grid point; with a batch/row-tile axis
            # this should become "parallel" to use v7x's second TensorCore.
            dimension_semantics=("arbitrary",),
            # Kernel footprint at N_p=128 is ~2 MiB; 32 MiB fits the scoped
            # VMEM of v5e, v6e and v7x alike with plenty of headroom.
            vmem_limit_bytes=32 * 1024 * 1024,
        ),
        cost_estimate=pl.CostEstimate(flops=flops, transcendentals=0,
                                      bytes_accessed=bytes_accessed),
    )(adj_p, feat_p, w1t_p, w2t_p)


# ---------------------------------------------------------------------------
# One-time (outside jit) preparation of graph / parameters: pad + bf16 cast.
# ---------------------------------------------------------------------------
def prepare_graph(adj, features):
    n, in_feats = features.shape
    n_p = _pad_to(n, 128)        # lane-pad N -> unmasked layout, full MXU K
    in_p = _pad_to(in_feats, 128)
    adj_p = (jnp.zeros((n_p, n_p), jnp.bfloat16)
             .at[:n, :n].set(adj.astype(jnp.bfloat16)))          # 0/1 -> exact in bf16
    feat_p = (jnp.zeros((n_p, in_p), jnp.bfloat16)
              .at[:n, :in_feats].set(features.astype(jnp.bfloat16)))
    return adj_p, feat_p


def prepare_params(w1, w2):
    """w1: (16, 1433), w2: (7, 16) in PyTorch nn.Linear layout (out, in)."""
    hid, in_feats = w1.shape
    out = w2.shape[0]
    in_p, hid_p, out_p = _pad_to(in_feats, 128), _pad_to(hid, 128), _pad_to(out, 128)
    w1t_p = (jnp.zeros((in_p, hid_p), jnp.bfloat16)
             .at[:in_feats, :hid].set(w1.T.astype(jnp.bfloat16)))
    w2t_p = (jnp.zeros((hid_p, out_p), jnp.bfloat16)
             .at[:hid, :out].set(w2.T.astype(jnp.bfloat16)))
    return w1t_p, w2t_p


def net_forward(adj_p, feat_p, w1t_p, w2t_p, *, n_nodes, out_feats):
    """Full Net forward on pre-padded bf16 inputs; returns (n_nodes, out_feats)."""
    h = gcn_net_fused(adj_p, feat_p, w1t_p, w2t_p)
    return h[:n_nodes, :out_feats]


# ---------------------------------------------------------------------------
if __name__ == "__main__":
    N = 64          # number of graph nodes (small synthetic graph)
    IN_FEATS = 1433
    HIDDEN = 16
    OUT = 7

    key = jax.random.PRNGKey(0)
    k_feat, k_adj, k_w1, k_w2 = jax.random.split(key, 4)

    # Deterministic synthetic inputs / parameters.
    features = jax.random.normal(k_feat, (N, IN_FEATS), jnp.float32)
    # Random directed graph (~10% edge density). A[i, j] = 1 iff edge j -> i.
    adj = (jax.random.uniform(k_adj, (N, N)) < 0.1).astype(jnp.float32)
    # nn.Linear(in, out, bias=False) weight shapes: (out, in).
    w1 = (jax.random.normal(k_w1, (HIDDEN, IN_FEATS), jnp.float32)
          * (1.0 / np.sqrt(IN_FEATS)))
    w2 = (jax.random.normal(k_w2, (OUT, HIDDEN), jnp.float32)
          * (1.0 / np.sqrt(HIDDEN)))

    # Hoisted, one-time padding + bf16 casting (outside jit).
    adj_p, feat_p = prepare_graph(adj, features)
    w1t_p, w2t_p = prepare_params(w1, w2)

    fwd = jax.jit(functools.partial(net_forward, n_nodes=N, out_feats=OUT))
    out = jax.block_until_ready(fwd(adj_p, feat_p, w1t_p, w2t_p))

    # Pure-JAX f32 reference with the original association (module semantics).
    h1_ref = jnp.maximum((adj @ features) @ w1.T, 0.0)
    ref = np.asarray((adj @ h1_ref) @ w2.T)
    out_np = np.asarray(out)

    # bf16 MXU operands with f32 accumulation -> scale-aware bf16 tolerance.
    scale = max(float(np.abs(ref).max()), 1.0)
    np.testing.assert_allclose(out_np, ref, rtol=5e-2, atol=5e-2 * scale)
    assert out_np.shape == (N, OUT)
    print("KERNEL_OK")
</pallas_src>

<mosaic_0001>
module attributes {stable_mosaic.version = 11 : i64} {
  func.func @fused_gcn_net_kernel(%arg0: i32, %arg1: memref<128x128xbf16, #tpu.memory_space<vmem>>, %arg2: memref<128x1536xbf16, #tpu.memory_space<vmem>>, %arg3: memref<1536x128xbf16, #tpu.memory_space<vmem>>, %arg4: memref<128x128xbf16, #tpu.memory_space<vmem>>, %arg5: memref<128x128xf32, #tpu.memory_space<vmem>>) attributes {dimension_semantics = [#tpu.dimension_semantics<arbitrary>], iteration_bounds = array<i64: 1>, scalar_prefetch = 0 : i64, scratch_operands = 0 : i64, tpu.core_type = #tpu.core_type<tc>, window_params = [{pipeline_mode = #tpu.pipeline_mode<synchronous>, transform_indices = @transform_0, window_bounds = array<i64: 128, 128>}, {pipeline_mode = #tpu.pipeline_mode<synchronous>, transform_indices = @transform_1, window_bounds = array<i64: 128, 1536>}, {pipeline_mode = #tpu.pipeline_mode<synchronous>, transform_indices = @transform_2, window_bounds = array<i64: 1536, 128>}, {pipeline_mode = #tpu.pipeline_mode<synchronous>, transform_indices = @transform_3, window_bounds = array<i64: 128, 128>}, {pipeline_mode = #tpu.pipeline_mode<synchronous>, transform_indices = @transform_4, window_bounds = array<i64: 128, 128>}]} {
    %c0 = arith.constant 0 : index
    %c0_0 = arith.constant 0 : index
    %0 = vector.load %arg1[%c0, %c0_0] : memref<128x128xbf16, #tpu.memory_space<vmem>>, vector<128x128xbf16>
    %c0_1 = arith.constant 0 : index
    %c0_2 = arith.constant 0 : index
    %1 = vector.load %arg2[%c0_1, %c0_2] : memref<128x1536xbf16, #tpu.memory_space<vmem>>, vector<128x1536xbf16>
    %c0_3 = arith.constant 0 : index
    %c0_4 = arith.constant 0 : index
    %2 = vector.load %arg3[%c0_3, %c0_4] : memref<1536x128xbf16, #tpu.memory_space<vmem>>, vector<1536x128xbf16>
    %cst = arith.constant dense<0.000000e+00> : vector<128x128xf32>
    %3 = tpu.matmul %1, %2, %cst {dimension_numbers = #tpu.dot_dimension_numbers<[1], [0], [0], [1], [0, 0, 1, 1], [], []>} : vector<128x1536xbf16>, vector<1536x128xbf16>, vector<128x128xf32> -> vector<128x128xf32>
    %4 = arith.truncf %3 : vector<128x128xf32> to vector<128x128xbf16>
    %cst_5 = arith.constant dense<0.000000e+00> : vector<128x128xf32>
    %5 = tpu.matmul %0, %4, %cst_5 {dimension_numbers = #tpu.dot_dimension_numbers<[1], [0], [0], [1], [0, 0, 1, 1], [], []>} : vector<128x128xbf16>, vector<128x128xbf16>, vector<128x128xf32> -> vector<128x128xf32>
    %cst_6 = arith.constant 0.000000e+00 : f32
    %6 = vector.broadcast %cst_6 : f32 to vector<128x128xf32>
    %7 = arith.maximumf %5, %6 : vector<128x128xf32>
    %8 = arith.truncf %7 : vector<128x128xf32> to vector<128x128xbf16>
    %c0_7 = arith.constant 0 : index
    %c0_8 = arith.constant 0 : index
    %9 = vector.load %arg4[%c0_7, %c0_8] : memref<128x128xbf16, #tpu.memory_space<vmem>>, vector<128x128xbf16>
    %cst_9 = arith.constant dense<0.000000e+00> : vector<128x128xf32>
    %10 = tpu.matmul %8, %9, %cst_9 {dimension_numbers = #tpu.dot_dimension_numbers<[1], [0], [0], [1], [0, 0, 1, 1], [], []>} : vector<128x128xbf16>, vector<128x128xbf16>, vector<128x128xf32> -> vector<128x128xf32>
    %11 = arith.truncf %10 : vector<128x128xf32> to vector<128x128xbf16>
    %cst_10 = arith.constant dense<0.000000e+00> : vector<128x128xf32>
    %12 = tpu.matmul %0, %11, %cst_10 {dimension_numbers = #tpu.dot_dimension_numbers<[1], [0], [0], [1], [0, 0, 1, 1], [], []>} : vector<128x128xbf16>, vector<128x128xbf16>, vector<128x128xf32> -> vector<128x128xf32>
    %c0_11 = arith.constant 0 : index
    %c0_12 = arith.constant 0 : index
    %13 = vector.load %arg5[%c0_11, %c0_12] : memref<128x128xf32, #tpu.memory_space<vmem>>, vector<128x128xf32>
    tpu.vector_store %arg5[%c0_11, %c0_12], %12 {strides = array<i32>} : memref<128x128xf32, #tpu.memory_space<vmem>>, vector<128x128xf32>,
    return
  }
  func.func @transform_0(%arg0: i32) -> (i32, i32) {
    %c0_i32 = arith.constant 0 : i32
    %c0_i32_0 = arith.constant 0 : i32
    %c0_i32_1 = arith.constant 0 : i32
    return %c0_i32, %c0_i32_0 : i32, i32
  }
  func.func @transform_1(%arg0: i32) -> (i32, i32) {
    %c0_i32 = arith.constant 0 : i32
    %c0_i32_0 = arith.constant 0 : i32
    %c0_i32_1 = arith.constant 0 : i32
    return %c0_i32, %c0_i32_0 : i32, i32
  }
  func.func @transform_2(%arg0: i32) -> (i32, i32) {
    %c0_i32 = arith.constant 0 : i32
    %c0_i32_0 = arith.constant 0 : i32
    %c0_i32_1 = arith.constant 0 : i32
    return %c0_i32, %c0_i32_0 : i32, i32
  }
  func.func @transform_3(%arg0: i32) -> (i32, i32) {
    %c0_i32 = arith.constant 0 : i32
    %c0_i32_0 = arith.constant 0 : i32
    %c0_i32_1 = arith.constant 0 : i32
    return %c0_i32, %c0_i32_0 : i32, i32
  }
  func.func @transform_4(%arg0: i32) -> (i32, i32) {
    %c0_i32 = arith.constant 0 : i32
    %c0_i32_0 = arith.constant 0 : i32
    %c0_i32_1 = arith.constant 0 : i32
    return %c0_i32, %c0_i32_0 : i32, i32
  }
}

</mosaic_0001>

<bundles_post_ra>
// kernel: net_forward.1
= control target key start
LH: loop header
LB: loop body
LE: loop exit
PB: predicated region body
PF: predicated region fallthrough
CT: control target
= control target key end

     0   :  { %9 = vsyncpa [#allocation3], 0  ;;  %s3829_s0 = inlined_call_operand.hbm [shape: bf16[128,128], index: 0, kind: input, shape index: {}]   ;;  %s3830_s1 = inlined_call_operand.hbm [shape: bf16[128,1536], index: 1, kind: input, shape index: {}]   ;;  %s3831_s2 = inlined_call_operand.hbm [shape: bf16[1536,128], index: 2, kind: input, shape index: {}]   ;;  %s3832_s3 = inlined_call_operand.hbm [shape: bf16[128,128], index: 3, kind: input, shape index: {}]   ;;  %s3833_s4 = inlined_call_operand.vmem [shape: f32[128,128], index: 4, kind: output, shape index: {}]  }
   0x1   :  { %10 = vsyncpa [#allocation5], 0 }
   0x2   :  { %11 = vsyncpa [#allocation8], 0  ;;  %s3583_s15 = smov [#allocation4]  }
   0x3   :  { %s29_s16 = sshll.u32 %s3583_s15, 4  ;;  %s30_s16 = int_to_ptr.vmem [resolvable:$true] %s29_s16 }
   0x4   :  { %s3505_s17 = scalar_lea.vmem %s30_s16, 12288  ;;  %p3510_p1 = scmp.lt.s32.totalorder %s30_s16, %s30_s16 }
   0x5   :  { %p3506_p0 = scmp.ne.s32.totalorder %s30_s16, %s3505_s17  ;;  %p3511_p2 = scmp.lt.s32.totalorder %s3505_s17, %s3505_s17 }
   0x7   :  { %p3512_p3 = por %p3511_p2, %p3510_p1 }
   0x9   :  { %p3513_p4 = pnand %p3512_p3, %p3506_p0 }
   0xb   :  { %3516 = shalt.err (!%p3513_p4)
}
   0xc   :  { %s3584_s18 = smov 768   ;;  %s3585_s19 = smov 48  }
   0xd   :  { %35 = dma.hbm_to_vmem [thread:$0]  %s3830_s1, 12288, %s30_s16, [#allocation5], %s3584_s18, %s3584_s18, %s3585_s19  }
   0xe   :  { %s3586_s22 = smov [#allocation2]  }
   0xf   :  { %s17_s23 = sshll.u32 %s3586_s22, 4  ;;  %s18_s23 = int_to_ptr.vmem [resolvable:$true] %s17_s23 }
  0x10   :  { %s3525_s24 = scalar_lea.vmem %s18_s23, 1024  ;;  %p3530_p6 = scmp.lt.s32.totalorder %s18_s23, %s18_s23 }
  0x11   :  { %p3526_p5 = scmp.ne.s32.totalorder %s18_s23, %s3525_s24  ;;  %p3531_p7 = scmp.lt.s32.totalorder %s3525_s24, %s3525_s24 }
  0x13   :  { %p3532_p8 = por %p3531_p7, %p3530_p6 }
  0x15   :  { %p3533_p9 = pnand %p3532_p8, %p3526_p5 }
  0x17   :  { %3536 = shalt.err (!%p3533_p9)
}
  0x18   :  { %s3587_s25 = smov 64   ;;  %s3588_s26 = smov 4  }
  0x19   :  { %23 = dma.hbm_to_vmem [thread:$0]  %s3829_s0, 1024, %s18_s23, [#allocation3], %s3587_s25, %s3587_s25, %s3588_s26  }
  0x1a   :  { %s3589_s29 = smov [#allocation6]   ;;  %s3590_s5 = smov [#allocation7]  }
  0x1b   :  { %s41_s30 = sshll.u32 %s3589_s29, 4  ;;  %s53_s1 = sshll.u32 %s3590_s5, 4  ;;  %s42_s30 = int_to_ptr.vmem [resolvable:$true] %s41_s30  ;;  %s54_s1 = int_to_ptr.vmem [resolvable:$true] %s53_s1 }
  0x1c   :  { %s3545_s6 = scalar_lea.vmem %s42_s30, 12288  ;;  %p3550_p11 = scmp.lt.s32.totalorder %s42_s30, %s42_s30 }
  0x1d   :  { %p3546_p10 = scmp.ne.s32.totalorder %s42_s30, %s3545_s6  ;;  %p3551_p12 = scmp.lt.s32.totalorder %s3545_s6, %s3545_s6 }
  0x1f   :  { %p3552_p13 = por %p3551_p12, %p3550_p11 }
  0x21   :  { %p3553_p0 = pnand %p3552_p13, %p3546_p10 }
  0x23   :  { %3556 = shalt.err (!%p3553_p0)
}
  0x24   :  { %47 = dma.hbm_to_vmem [thread:$0]  %s3831_s2, 12288, %s42_s30, [#allocation5], %s3587_s25, %s3587_s25, %s3588_s26  }
  0x25   :  { %s3565_s9 = scalar_lea.vmem %s54_s1, 1024  ;;  %p3570_p2 = scmp.lt.s32.totalorder %s54_s1, %s54_s1 }
  0x26   :  { %p3566_p1 = scmp.ne.s32.totalorder %s54_s1, %s3565_s9  ;;  %p3571_p3 = scmp.lt.s32.totalorder %s3565_s9, %s3565_s9 }
  0x28   :  { %p3572_p4 = por %p3571_p3, %p3570_p2 }
  0x2a   :  { %p3573_p5 = pnand %p3572_p4, %p3566_p1 }
  0x2c   :  { %3576 = shalt.err (!%p3573_p5)
}
  0x2d   :  { %59 = dma.hbm_to_vmem [thread:$0]  %s3832_s3, 1024, %s54_s1, [#allocation8], %s3587_s25, %s3587_s25, %s3588_s26  }
  0x2e   :  { %3577 = dma.done.wait [#allocation3], 1024  }
  0x2f   :  { %3578 = vsyncadd [#allocation3], 4294966272 }
  0x30   :  { %3579 = dma.done.wait [#allocation5], 24576  }
  0x31   :  { %3580 = vsyncadd [#allocation5], 4294942720 }
  0x32   :  { %3581 = dma.done.wait [#allocation8], 1024  }
  0x33   :  { %3582 = vsyncadd [#allocation8], 4294966272  ;;  %v3241_v0 = vld [vmem:[#allocation6 + $0x78] sm:$0xff]   ;;  %v3245_v4 = vld [vmem:[#allocation6 + $0x70] sm:$0xff]  }
  0x34   :  { %v3242_v1 = vld [vmem:[#allocation6 + $0xf8] sm:$0xff]   ;;  %2689 = vmatprep.subr.bf16.mxu0 %v3241_v0  ;;  %v3246_v5 = vld [vmem:[#allocation6 + $0xf0] sm:$0xff]   ;;  %v3249_v8 = vld [vmem:[#allocation6 + $0x68] sm:$0xff]  }
  0x35   :  { %v3243_v2 = vld [vmem:[#allocation6 + $0x38] sm:$0xff]   ;;  %2753 = vmatprep.subr.bf16.mxu1 %v3242_v1  ;;  %v3247_v6 = vld [vmem:[#allocation6 + $0x30] sm:$0xff]   ;;  %v3250_v9 = vld [vmem:[#allocation6 + $0xe8] sm:$0xff]  }
  0x36   :  { %v3244_v3 = vld [vmem:[#allocation6 + $0xb8] sm:$0xff]   ;;  %2690 = vmatpush3.bf16.msra.mxu0 %v3243_v2  ;;  %v3248_v7 = vld [vmem:[#allocation6 + $0xb0] sm:$0xff]   ;;  %v3251_v10 = vld [vmem:[#allocation6 + $0x28] sm:$0xff]  }
  0x37   :  { %2754 = vmatpush3.bf16.msra.mxu1 %v3244_v3  ;;  %2691 = vmatprep.subr.bf16.mxu0 %v3245_v4  ;;  %v3252_v11 = vld [vmem:[#allocation6 + $0xa8] sm:$0xff]   ;;  %v3253_v12 = vld [vmem:[#allocation6 + $0x60] sm:$0xff]   ;;  %v3257_v16 = vld [vmem:[#allocation6 + $0x58] sm:$0xff]  }
  0x38   :  { %2755 = vmatprep.subr.bf16.mxu1 %v3246_v5  ;;  %v3254_v13 = vld [vmem:[#allocation6 + $0xe0] sm:$0xff]   ;;  %v3258_v17 = vld [vmem:[#allocation6 + $0xd8] sm:$0xff]   ;;  %v3261_v20 = vld [vmem:[#allocation6 + $0x50] sm:$0xff]  }
  0x39   :  { %v3255_v14 = vld [vmem:[#allocation6 + $0x20] sm:$0xff]   ;;  %v3259_v18 = vld [vmem:[#allocation6 + $0x18] sm:$0xff]   ;;  %v3262_v21 = vld [vmem:[#allocation6 + $0xd0] sm:$0xff]  }
  0x3a   :  { %2692 = vmatpush3.bf16.msra.mxu0 %v3247_v6  ;;  %v3256_v15 = vld [vmem:[#allocation6 + $0xa0] sm:$0xff]   ;;  %v3260_v19 = vld [vmem:[#allocation6 + $0x98] sm:$0xff]   ;;  %v3263_v22 = vld [vmem:[#allocation6 + $0x10] sm:$0xff]  }
  0x3b   :  { %2756 = vmatpush3.bf16.msra.mxu1 %v3248_v7  ;;  %2693 = vmatprep.subr.bf16.mxu0 %v3249_v8  ;;  %v3264_v23 = vld [vmem:[#allocation6 + $0x90] sm:$0xff]   ;;  %v3265_v24 = vld [vmem:[#allocation6 + $0x48] sm:$0xff]   ;;  %v3269_v28 = vld [vmem:[#allocation6 + $0x40] sm:$0xff]  }
  0x3c   :  { %2757 = vmatprep.subr.bf16.mxu1 %v3250_v9  ;;  %v3266_v25 = vld [vmem:[#allocation6 + $0xc8] sm:$0xff]   ;;  %v3270_v29 = vld [vmem:[#allocation6 + $0xc0] sm:$0xff]   ;;  %v3303_v43 = vld [vmem:[#allocation6 + $0x178] sm:$0xff]  }
  0x3d   :  { %v3267_v26 = vld [vmem:[#allocation6 + $0x8] sm:$0xff]   ;;  %v3271_v30 = vld [vmem:[#allocation6] sm:$0xff]   ;;  %v3304_v46 = vld [vmem:[#allocation6 + $0x1f8] sm:$0xff]  }
  0x3e   :  { %2694 = vmatpush3.bf16.msra.mxu0 %v3251_v10  ;;  %v3268_v27 = vld [vmem:[#allocation6 + $0x88] sm:$0xff]   ;;  %v3272_v31 = vld [vmem:[#allocation6 + $0x80] sm:$0xff]   ;;  %v3305_v48 = vld [vmem:[#allocation6 + $0x138] sm:$0xff]  }
  0x3f   :  { %2758 = vmatpush3.bf16.msra.mxu1 %v3252_v11  ;;  %2695 = vmatprep.subr.bf16.mxu0 %v3253_v12  ;;  %v3273_v32 = vld [vmem:[#allocation4] ss:$48 sps:$4 sm:$0xff]   ;;  %v3275_v33 = vld [vmem:[#allocation4 + $0x4] ss:$48 sps:$4 sm:$0xff]   ;;  %v3276_v34 = vld [vmem:[#allocation4 + $0x8] ss:$48 sps:$4 sm:$0xff]  }
  0x40   :  { %2759 = vmatprep.subr.bf16.mxu1 %v3254_v13  ;;  %v3278_v35 = vld [vmem:[#allocation4 + $0xc] ss:$48 sps:$4 sm:$0xff]   ;;  %1465 = vmatprep.mubr.bf16.mxu0 %v3275_v33  ;;  %v3279_v36 = vld [vmem:[#allocation4 + $0x64] ss:$48 sps:$4 sm:$0xff]   ;;  %v3283_v38 = vld [vmem:[#allocation4 + $0x60] ss:$48 sps:$4 sm:$0xff]  }
  0x41   :  { %1562 = vmatprep.mubr.bf16.mxu1 %v3278_v35  ;;  %v3281_v37 = vld [vmem:[#allocation4 + $0x6c] ss:$48 sps:$4 sm:$0xff]   ;;  %v3284_v39 = vld [vmem:[#allocation4 + $0x68] ss:$48 sps:$4 sm:$0xff]   ;;  %v3285_v40 = vld [vmem:[#allocation4 + $0xc4] ss:$48 sps:$4 sm:$0xff]  }
  0x42   :  { %2696 = vmatpush3.bf16.msra.mxu0 %v3255_v14  ;;  %v3287_v41 = vld [vmem:[#allocation4 + $0xcc] ss:$48 sps:$4 sm:$0xff]   ;;  %v3289_v42 = vld [vmem:[#allocation4 + $0xc0] ss:$48 sps:$4 sm:$0xff]   ;;  %v3290_v44 = vld [vmem:[#allocation4 + $0xc8] ss:$48 sps:$4 sm:$0xff]  }
  0x43   :  { %2760 = vmatpush3.bf16.msra.mxu1 %v3256_v15  ;;  %2697 = vmatprep.subr.bf16.mxu0 %v3257_v16  ;;  %v3291_v45 = vld [vmem:[#allocation4 + $0x124] ss:$48 sps:$4 sm:$0xff]   ;;  %v3293_v47 = vld [vmem:[#allocation4 + $0x12c] ss:$48 sps:$4 sm:$0xff]   ;;  %v3295_v54 = vld [vmem:[#allocation4 + $0x120] ss:$48 sps:$4 sm:$0xff]  }
  0x44   :  { %2761 = vmatprep.subr.bf16.mxu1 %v3258_v17  ;;  %v3306_v49 = vld [vmem:[#allocation6 + $0x1b8] sm:$0xff]   ;;  %v3307_v50 = vld [vmem:[#allocation6 + $0x170] sm:$0xff]   ;;  %v3317_v58 = vld [vmem:[#allocation6 + $0x168] sm:$0xff]  }
  0x45   :  { %v3308_v51 = vld [vmem:[#allocation6 + $0x1f0] sm:$0xff]   ;;  %v3296_v55 = vld [vmem:[#allocation4 + $0x128] ss:$48 sps:$4 sm:$0xff]   ;;  %v3299_v57 = vld [vmem:[#allocation4 + $0x18c] ss:$48 sps:$4 sm:$0xff]  }
  0x46   :  { %2698 = vmatpush3.bf16.msra.mxu0 %v3259_v18  ;;  %v3309_v52 = vld [vmem:[#allocation6 + $0x130] sm:$0xff]   ;;  %v3318_v59 = vld [vmem:[#allocation6 + $0x1e8] sm:$0xff]   ;;  %v3321_v62 = vld [vmem:[#allocation6 + $0x160] sm:$0xff]  }
  0x47   :  { %2762 = vmatpush3.bf16.msra.mxu1 %v3260_v19  ;;  %2699 = vmatprep.subr.bf16.mxu0 %v3261_v20  ;;  %v3310_v53 = vld [vmem:[#allocation6 + $0x1b0] sm:$0xff]   ;;  %v3319_v60 = vld [vmem:[#allocation6 + $0x128] sm:$0xff]   ;;  %v3322_v63 = vld [vmem:[#allocation6 + $0x1e0] sm:$0xff]  }
  0x48   :  { %2763 = vmatprep.subr.bf16.mxu1 %v3262_v21  ;;  %v3297_v56 = vld [vmem:[#allocation4 + $0x184] ss:$48 sps:$4 sm:$0xff]   ;;  %v3320_v61 = vld [vmem:[#allocation6 + $0x1a8] sm:$0xff]   ;;  %v3301_v0 = vld [vmem:[#allocation4 + $0x180] ss:$48 sps:$4 sm:$0xff]  }
  0x49   :  { %v3323_v1 = vld [vmem:[#allocation6 + $0x120] sm:$0xff]   ;;  %v3302_v3 = vld [vmem:[#allocation4 + $0x188] ss:$48 sps:$4 sm:$0xff]   ;;  %v3313_v5 = vld [vmem:[#allocation4 + $0x1ec] ss:$48 sps:$4 sm:$0xff]  }
  0x4a   :  { %2700 = vmatpush3.bf16.msra.mxu0 %v3263_v22  ;;  %v3324_v2 = vld [vmem:[#allocation6 + $0x1a0] sm:$0xff]   ;;  %v3331_v6 = vld [vmem:[#allocation6 + $0x158] sm:$0xff]   ;;  %v3335_v13 = vld [vmem:[#allocation6 + $0x150] sm:$0xff]  }
  0x4b   :  { %2764 = vmatpush3.bf16.msra.mxu1 %v3264_v23  ;;  %2701 = vmatprep.subr.bf16.mxu0 %v3265_v24  ;;  %v3311_v4 = vld [vmem:[#allocation4 + $0x1e4] ss:$48 sps:$4 sm:$0xff]   ;;  %v3332_v7 = vld [vmem:[#allocation6 + $0x1d8] sm:$0xff]   ;;  %v3315_v9 = vld [vmem:[#allocation4 + $0x1e0] ss:$48 sps:$4 sm:$0xff]  }
  0x4c   :  { %2765 = vmatprep.subr.bf16.mxu1 %v3266_v25  ;;  %v3333_v8 = vld [vmem:[#allocation6 + $0x118] sm:$0xff]   ;;  %v3325_v12 = vld [vmem:[#allocation4 + $0x244] ss:$48 sps:$4 sm:$0xff]   ;;  %v3329_v18 = vld [vmem:[#allocation4 + $0x240] ss:$48 sps:$4 sm:$0xff]  }
  0x4d   :  { %v3334_v10 = vld [vmem:[#allocation6 + $0x198] sm:$0xff]   ;;  %v3336_v15 = vld [vmem:[#allocation6 + $0x1d0] sm:$0xff]   ;;  %v3345_v19 = vld [vmem:[#allocation6 + $0x148] sm:$0xff]  }
  0x4e   :  { %2702 = vmatpush3.bf16.msra.mxu0 %v3267_v26  ;;  %v3316_v11 = vld [vmem:[#allocation4 + $0x1e8] ss:$48 sps:$4 sm:$0xff]   ;;  %v3327_v14 = vld [vmem:[#allocation4 + $0x24c] ss:$48 sps:$4 sm:$0xff]   ;;  %v3337_v16 = vld [vmem:[#allocation6 + $0x110] sm:$0xff]  }
  0x4f   :  { %2766 = vmatpush3.bf16.msra.mxu1 %v3268_v27  ;;  %2703 = vmatprep.subr.bf16.mxu0 %v3269_v28  ;;  %v3338_v17 = vld [vmem:[#allocation6 + $0x190] sm:$0xff]   ;;  %v3330_v20 = vld [vmem:[#allocation4 + $0x248] ss:$48 sps:$4 sm:$0xff]   ;;  %v3341_v23 = vld [vmem:[#allocation4 + $0x2ac] ss:$48 sps:$4 sm:$0xff]  }
  0x50   :  { %2767 = vmatprep.subr.bf16.mxu1 %v3270_v29  ;;  %v3339_v21 = vld [vmem:[#allocation4 + $0x2a4] ss:$48 sps:$4 sm:$0xff]   ;;  %v3346_v22 = vld [vmem:[#allocation6 + $0x1c8] sm:$0xff]  }
  0x51   :  { %v3347_v24 = vld [vmem:[#allocation6 + $0x108] sm:$0xff]   ;;  %v3349_v26 = vld [vmem:[#allocation6 + $0x140] sm:$0xff]  }
  0x52   :  { %2704 = vmatpush3.bf16.msra.mxu0 %v3271_v30  ;;  %v3348_v25 = vld [vmem:[#allocation6 + $0x188] sm:$0xff]   ;;  %v3350_v27 = vld [vmem:[#allocation6 + $0x1c0] sm:$0xff]  }
  0x53   :  { %2768 = vmatpush3.bf16.msra.mxu1 %v3272_v31  ;;  %2817 = vmatprep.subr.bf16.mxu0 %v3303_v43  ;;  %v3351_v28 = vld [vmem:[#allocation6 + $0x100] sm:$0xff]   ;;  %v3344_v31 = vld [vmem:[#allocation4 + $0x2a8] ss:$48 sps:$4 sm:$0xff]   ;;  %v3358_v33 = vld [vmem:[#allocation4 + $0x1c] ss:$48 sps:$4 sm:$0xff]  }
  0x54   :  { %2881 = vmatprep.subr.bf16.mxu1 %v3304_v46  ;;  %v3352_v29 = vld [vmem:[#allocation6 + $0x180] sm:$0xff]   ;;  %v3356_v35 = vld [vmem:[#allocation4 + $0x18] ss:$48 sps:$4 sm:$0xff]   ;;  %v3367_v46 = vld [vmem:[#allocation4 + $0xdc] ss:$48 sps:$4 sm:$0xff]  }
  0x55   :  { %1466 = vmatmul.mubr.bf16.vlgmr.msra.gmra.mxu0 %v3273_v32  ;;  %v3343_v30 = vld [vmem:[#allocation4 + $0x2a0] ss:$48 sps:$4 sm:$0xff]   ;;  %v3355_v32 = vld [vmem:[#allocation4 + $0x14] ss:$48 sps:$4 sm:$0xff]   ;;  %v3364_v43 = vld [vmem:[#allocation4 + $0x78] ss:$48 sps:$4 sm:$0xff]  }
  0x56   :  { %1563 = vmatmul.mubr.bf16.vlgmr.msra.gmra.mxu1 %v3276_v34  ;;  %1473 = vmatprep.mubr.bf16.mxu0 %v3279_v36  ;;  %v3353_v34 = vld [vmem:[#allocation4 + $0x10] ss:$48 sps:$4 sm:$0xff]   ;;  %v3359_v36 = vld [vmem:[#allocation4 + $0x74] ss:$48 sps:$4 sm:$0xff]  }
  0x57   :  { %1570 = vmatprep.mubr.bf16.mxu1 %v3281_v37  ;;  %2818 = vmatpush3.bf16.msra.mxu0 %v3305_v48  ;;  %v3361_v37 = vld [vmem:[#allocation4 + $0x7c] ss:$48 sps:$4 sm:$0xff]   ;;  %v3389_v48 = vld [vmem:[#allocation6 + $0x230] sm:$0xff]  }
  0x58   :  { %2882 = vmatpush3.bf16.msra.mxu1 %v3306_v49  ;;  %2819 = vmatprep.subr.bf16.mxu0 %v3307_v50  ;;  %v3390_v49 = vld [vmem:[#allocation6 + $0x2b0] sm:$0xff]  }
  0x59   :  { %2883 = vmatprep.subr.bf16.mxu1 %v3308_v51  ;;  %v3369_v50 = vld [vmem:[#allocation4 + $0xd0] ss:$48 sps:$4 sm:$0xff]   ;;  %v3397_v51 = vld [vmem:[#allocation6 + $0x268] sm:$0xff]  }
  0x5b   :  { %2820 = vmatpush3.bf16.msra.mxu0 %v3309_v52  ;;  %v3370_v52 = vld [vmem:[#allocation4 + $0xd8] ss:$48 sps:$4 sm:$0xff]  }
  0x5c   :  { %2884 = vmatpush3.bf16.msra.mxu1 %v3310_v53  ;;  %2821 = vmatprep.subr.bf16.mxu0 %v3317_v58  ;;  %v3371_v53 = vld [vmem:[#allocation4 + $0x134] ss:$48 sps:$4 sm:$0xff]  }
  0x5d   :  { %1474 = vmatmul.mubr.bf16.gmra.mxu0 %v3283_v38  ;;  %2885 = vmatprep.subr.bf16.mxu1 %v3318_v59  ;;  %v3383_v38 = vld [vmem:[#allocation6 + $0x278] sm:$0xff]   ;;  %v3401_v58 = vld [vmem:[#allocation6 + $0x260] sm:$0xff]  }
  0x5e   :  { %1571 = vmatmul.mubr.bf16.gmra.mxu1 %v3284_v39  ;;  %1481 = vmatprep.mubr.bf16.mxu0 %v3285_v40  ;;  %v3384_v39 = vld [vmem:[#allocation6 + $0x2f8] sm:$0xff]   ;;  %v3402_v59 = vld [vmem:[#allocation6 + $0x2e0] sm:$0xff]  }
  0x5f   :  { %1578 = vmatprep.mubr.bf16.mxu1 %v3287_v41  ;;  %2822 = vmatpush3.bf16.msra.mxu0 %v3319_v60  ;;  %v3385_v40 = vld [vmem:[#allocation6 + $0x238] sm:$0xff]   ;;  %v3363_v41 = vld [vmem:[#allocation4 + $0x70] ss:$48 sps:$4 sm:$0xff]  }
  0x60   :  { %2886 = vmatpush3.bf16.msra.mxu1 %v3320_v61  ;;  %2823 = vmatprep.subr.bf16.mxu0 %v3321_v62  ;;  %v3403_v60 = vld [vmem:[#allocation6 + $0x220] sm:$0xff]  }
  0x61   :  { %2887 = vmatprep.subr.bf16.mxu1 %v3322_v63  ;;  %v3404_v61 = vld [vmem:[#allocation6 + $0x2a0] sm:$0xff]   ;;  %v3376_v63 = vld [vmem:[#allocation4 + $0x138] ss:$48 sps:$4 sm:$0xff]  }
  0x62   :  { %v3375_v62 = vld [vmem:[#allocation4 + $0x130] ss:$48 sps:$4 sm:$0xff]  }
  0x63   :  { %2824 = vmatpush3.bf16.msra.mxu0 %v3323_v1  ;;  %v3379_v1 = vld [vmem:[#allocation4 + $0x19c] ss:$48 sps:$4 sm:$0xff]  }
  0x64   :  { %2888 = vmatpush3.bf16.msra.mxu1 %v3324_v2  ;;  %2825 = vmatprep.subr.bf16.mxu0 %v3331_v6  ;;  %v3411_v2 = vld [vmem:[#allocation6 + $0x258] sm:$0xff]   ;;  %v3415_v6 = vld [vmem:[#allocation6 + $0x250] sm:$0xff]  }
  0x65   :  { %1482 = vmatmul.mubr.bf16.gmra.mxu0 %v3289_v42  ;;  %2889 = vmatprep.subr.bf16.mxu1 %v3332_v7  ;;  %v3386_v42 = vld [vmem:[#allocation6 + $0x2b8] sm:$0xff]   ;;  %v3416_v7 = vld [vmem:[#allocation6 + $0x2d0] sm:$0xff]  }
  0x66   :  { %1579 = vmatmul.mubr.bf16.gmra.mxu1 %v3290_v44  ;;  %1489 = vmatprep.mubr.bf16.mxu0 %v3291_v45  ;;  %v3365_v44 = vld [vmem:[#allocation4 + $0xd4] ss:$48 sps:$4 sm:$0xff]  }
  0x67   :  { %1586 = vmatprep.mubr.bf16.mxu1 %v3293_v47  ;;  %2826 = vmatpush3.bf16.msra.mxu0 %v3333_v8  ;;  %v3387_v45 = vld [vmem:[#allocation6 + $0x270] sm:$0xff]  }
  0x68   :  { %2890 = vmatpush3.bf16.msra.mxu1 %v3334_v10  ;;  %2827 = vmatprep.subr.bf16.mxu0 %v3335_v13  ;;  %v3388_v47 = vld [vmem:[#allocation6 + $0x2f0] sm:$0xff]   ;;  %v3393_v13 = vld [vmem:[#allocation4 + $0x1fc] ss:$48 sps:$4 sm:$0xff]  }
  0x69   :  { %2891 = vmatprep.subr.bf16.mxu1 %v3336_v15  ;;  %v3381_v8 = vld [vmem:[#allocation4 + $0x190] ss:$48 sps:$4 sm:$0xff]   ;;  %v3426_v15 = vld [vmem:[#allocation6 + $0x2c8] sm:$0xff]  }
  0x6a   :  { %v3418_v10 = vld [vmem:[#allocation6 + $0x290] sm:$0xff]  }
  0x6b   :  { %2828 = vmatpush3.bf16.msra.mxu0 %v3337_v16  ;;  %v3427_v16 = vld [vmem:[#allocation6 + $0x208] sm:$0xff]  }
  0x6c   :  { %2892 = vmatpush3.bf16.msra.mxu1 %v3338_v17  ;;  %2829 = vmatprep.subr.bf16.mxu0 %v3345_v19  ;;  %v3395_v17 = vld [vmem:[#allocation4 + $0x1f0] ss:$48 sps:$4 sm:$0xff]   ;;  %v3396_v19 = vld [vmem:[#allocation4 + $0x1f8] ss:$48 sps:$4 sm:$0xff]  }
  0x6d   :  { %1490 = vmatmul.mubr.bf16.gmra.mxu0 %v3295_v54  ;;  %2893 = vmatprep.subr.bf16.mxu1 %v3346_v22  ;;  %v3398_v54 = vld [vmem:[#allocation6 + $0x2e8] sm:$0xff]  }
  0x6e   :  { %1587 = vmatmul.mubr.bf16.gmra.mxu1 %v3296_v55  ;;  %1497 = vmatprep.mubr.bf16.mxu0 %v3297_v56  ;;  %v3373_v55 = vld [vmem:[#allocation4 + $0x13c] ss:$48 sps:$4 sm:$0xff]  }
  0x6f   :  { %1594 = vmatprep.mubr.bf16.mxu1 %v3299_v57  ;;  %2830 = vmatpush3.bf16.msra.mxu0 %v3347_v24  ;;  %v3399_v56 = vld [vmem:[#allocation6 + $0x228] sm:$0xff]   ;;  %v3431_v24 = vld [vmem:[#allocation6 + $0x200] sm:$0xff]  }
  0x70   :  { %2894 = vmatpush3.bf16.msra.mxu1 %v3348_v25  ;;  %2831 = vmatprep.subr.bf16.mxu0 %v3349_v26  ;;  %v3400_v57 = vld [vmem:[#allocation6 + $0x2a8] sm:$0xff]   ;;  %v3432_v25 = vld [vmem:[#allocation6 + $0x280] sm:$0xff]  }
  0x71   :  { %2895 = vmatprep.subr.bf16.mxu1 %v3350_v27  ;;  %v3407_v22 = vld [vmem:[#allocation4 + $0x25c] ss:$48 sps:$4 sm:$0xff]   ;;  %v3409_v26 = vld [vmem:[#allocation4 + $0x250] ss:$48 sps:$4 sm:$0xff]   ;;  %v3410_v27 = vld [vmem:[#allocation4 + $0x258] ss:$48 sps:$4 sm:$0xff]  }
  0x73   :  { %2832 = vmatpush3.bf16.msra.mxu0 %v3351_v28  ;;  %v3419_v28 = vld [vmem:[#allocation4 + $0x2b4] ss:$48 sps:$4 sm:$0xff]  }
  0x74   :  { %2896 = vmatpush3.bf16.msra.mxu1 %v3352_v29  ;;  %2945 = vmatprep.subr.bf16.mxu0 %v3383_v38  ;;  %v3421_v29 = vld [vmem:[#allocation4 + $0x2bc] ss:$48 sps:$4 sm:$0xff]   ;;  %v3443_v38 = vld [vmem:[#allocation4 + $0x80] ss:$48 sps:$4 sm:$0xff]  }
  0x75   :  { %1498 = vmatmul.mubr.bf16.gmra.mxu0 %v3301_v0  ;;  %3009 = vmatprep.subr.bf16.mxu1 %v3384_v39  ;;  %v3377_v0 = vld [vmem:[#allocation4 + $0x194] ss:$48 sps:$4 sm:$0xff]   ;;  %v3444_v39 = vld [vmem:[#allocation4 + $0x88] ss:$48 sps:$4 sm:$0xff]  }
  0x76   :  { %1595 = vmatmul.mubr.bf16.gmra.mxu1 %v3302_v3  ;;  %1505 = vmatprep.mubr.bf16.mxu0 %v3311_v4  ;;  %v3412_v3 = vld [vmem:[#allocation6 + $0x2d8] sm:$0xff]  }
  0x77   :  { %1602 = vmatprep.mubr.bf16.mxu1 %v3313_v5  ;;  %v3413_v4 = vld [vmem:[#allocation6 + $0x218] sm:$0xff]  }
  0x78   :  { %v3414_v5 = vld [vmem:[#allocation6 + $0x298] sm:$0xff]  }
  0x7d   :  { %1506 = vmatmul.mubr.bf16.gmra.mxu0 %v3315_v9  ;;  %v3417_v9 = vld [vmem:[#allocation6 + $0x210] sm:$0xff]  }
  0x7e   :  { %1603 = vmatmul.mubr.bf16.gmra.mxu1 %v3316_v11  ;;  %1513 = vmatprep.mubr.bf16.mxu0 %v3325_v12  ;;  %v3382_v11 = vld [vmem:[#allocation4 + $0x198] ss:$48 sps:$4 sm:$0xff]   ;;  %v3391_v12 = vld [vmem:[#allocation4 + $0x1f4] ss:$48 sps:$4 sm:$0xff]  }
  0x7f   :  { %1610 = vmatprep.mubr.bf16.mxu1 %v3327_v14  ;;  %v3425_v14 = vld [vmem:[#allocation6 + $0x248] sm:$0xff]  }
  0x85   :  { %1514 = vmatmul.mubr.bf16.gmra.mxu0 %v3329_v18  ;;  %v3428_v18 = vld [vmem:[#allocation6 + $0x288] sm:$0xff]  }
  0x86   :  { %1611 = vmatmul.mubr.bf16.gmra.mxu1 %v3330_v20  ;;  %1521 = vmatprep.mubr.bf16.mxu0 %v3339_v21  ;;  %v3405_v20 = vld [vmem:[#allocation4 + $0x254] ss:$48 sps:$4 sm:$0xff]  }
  0x87   :  { %1618 = vmatprep.mubr.bf16.mxu1 %v3341_v23  ;;  %v3429_v21 = vld [vmem:[#allocation6 + $0x240] sm:$0xff]  }
  0x88   :  { %v3430_v23 = vld [vmem:[#allocation6 + $0x2c0] sm:$0xff]  }
  0x8d   :  { %1522 = vmatmul.mubr.bf16.gmra.mxu0 %v3343_v30  ;;  %v3423_v30 = vld [vmem:[#allocation4 + $0x2b0] ss:$48 sps:$4 sm:$0xff]  }
  0x8e   :  { %1619 = vmatmul.mubr.bf16.gmra.mxu1 %v3344_v31  ;;  %1659 = vmatprep.mubr.bf16.mxu0 %v3355_v32  ;;  %v3424_v31 = vld [vmem:[#allocation4 + $0x2b8] ss:$48 sps:$4 sm:$0xff]   ;;  %v3435_v32 = vld [vmem:[#allocation4 + $0x24] ss:$48 sps:$4 sm:$0xff]  }
  0x8f   :  { %1756 = vmatprep.mubr.bf16.mxu1 %v3358_v33  ;;  %v3438_v33 = vld [vmem:[#allocation4 + $0x2c] ss:$48 sps:$4 sm:$0xff]  }
  0x95   :  { %1660 = vmatmul.mubr.bf16.vlgmr.msra.gmra.mxu0 %v3353_v34  ;;  %v3433_v34 = vld [vmem:[#allocation4 + $0x20] ss:$48 sps:$4 sm:$0xff]  }
  0x96   :  { %1757 = vmatmul.mubr.bf16.vlgmr.msra.gmra.mxu1 %v3356_v35  ;;  %1667 = vmatprep.mubr.bf16.mxu0 %v3359_v36  ;;  %v3436_v35 = vld [vmem:[#allocation4 + $0x28] ss:$48 sps:$4 sm:$0xff]   ;;  %v3439_v36 = vld [vmem:[#allocation4 + $0x84] ss:$48 sps:$4 sm:$0xff]  }
  0x97   :  { %1764 = vmatprep.mubr.bf16.mxu1 %v3361_v37  ;;  %2946 = vmatpush3.bf16.msra.mxu0 %v3385_v40  ;;  %v3441_v37 = vld [vmem:[#allocation4 + $0x8c] ss:$48 sps:$4 sm:$0xff]   ;;  %v3445_v40 = vld [vmem:[#allocation4 + $0xe4] ss:$48 sps:$4 sm:$0xff]  }
  0x98   :  { %3010 = vmatpush3.bf16.msra.mxu1 %v3386_v42  ;;  %2947 = vmatprep.subr.bf16.mxu0 %v3387_v45  ;;  %v3449_v42 = vld [vmem:[#allocation4 + $0xe0] ss:$48 sps:$4 sm:$0xff]   ;;  %v3453_v45 = vld [vmem:[#allocation4 + $0x14c] ss:$48 sps:$4 sm:$0xff]  }
  0x99   :  { %3011 = vmatprep.subr.bf16.mxu1 %v3388_v47  ;;  %v3456_v47 = vld [vmem:[#allocation4 + $0x148] ss:$48 sps:$4 sm:$0xff]  }
  0x9b   :  { %2948 = vmatpush3.bf16.msra.mxu0 %v3389_v48  ;;  %v3457_v48 = vld [vmem:[#allocation4 + $0x1a4] ss:$48 sps:$4 sm:$0xff]  }
  0x9c   :  { %3012 = vmatpush3.bf16.msra.mxu1 %v3390_v49  ;;  %2949 = vmatprep.subr.bf16.mxu0 %v3397_v51  ;;  %v3459_v49 = vld [vmem:[#allocation4 + $0x1ac] ss:$48 sps:$4 sm:$0xff]   ;;  %v3462_v51 = vld [vmem:[#allocation4 + $0x1a8] ss:$48 sps:$4 sm:$0xff]  }
  0x9d   :  { %1668 = vmatmul.mubr.bf16.gmra.mxu0 %v3363_v41  ;;  %3013 = vmatprep.subr.bf16.mxu1 %v3398_v54  ;;  %v3447_v41 = vld [vmem:[#allocation4 + $0xec] ss:$48 sps:$4 sm:$0xff]   ;;  %v3467_v54 = vld [vmem:[#allocation4 + $0x200] ss:$48 sps:$4 sm:$0xff]  }
  0x9e   :  { %1765 = vmatmul.mubr.bf16.gmra.mxu1 %v3364_v43  ;;  %1675 = vmatprep.mubr.bf16.mxu0 %v3365_v44  ;;  %v3450_v43 = vld [vmem:[#allocation4 + $0xe8] ss:$48 sps:$4 sm:$0xff]   ;;  %v3451_v44 = vld [vmem:[#allocation4 + $0x144] ss:$48 sps:$4 sm:$0xff]  }
  0x9f   :  { %1772 = vmatprep.mubr.bf16.mxu1 %v3367_v46  ;;  %2950 = vmatpush3.bf16.msra.mxu0 %v3399_v56  ;;  %v3455_v46 = vld [vmem:[#allocation4 + $0x140] ss:$48 sps:$4 sm:$0xff]   ;;  %v3469_v56 = vld [vmem:[#allocation4 + $0x264] ss:$48 sps:$4 sm:$0xff]  }
  0xa0   :  { %3014 = vmatpush3.bf16.msra.mxu1 %v3400_v57  ;;  %2951 = vmatprep.subr.bf16.mxu0 %v3401_v58  ;;  %v3471_v57 = vld [vmem:[#allocation4 + $0x26c] ss:$48 sps:$4 sm:$0xff]   ;;  %v3473_v58 = vld [vmem:[#allocation4 + $0x260] ss:$48 sps:$4 sm:$0xff]  }
  0xa1   :  { %3015 = vmatprep.subr.bf16.mxu1 %v3402_v59  ;;  %v3474_v59 = vld [vmem:[#allocation4 + $0x268] ss:$48 sps:$4 sm:$0xff]  }
  0xa3   :  { %2952 = vmatpush3.bf16.msra.mxu0 %v3403_v60  ;;  %v3475_v60 = vld [vmem:[#allocation4 + $0x2c4] ss:$48 sps:$4 sm:$0xff]  }
  0xa4   :  { %3016 = vmatpush3.bf16.msra.mxu1 %v3404_v61  ;;  %2953 = vmatprep.subr.bf16.mxu0 %v3411_v2  ;;  %v3477_v61 = vld [vmem:[#allocation4 + $0x2cc] ss:$48 sps:$4 sm:$0xff]  }
  0xa5   :  { %1676 = vmatmul.mubr.bf16.gmra.mxu0 %v3369_v50  ;;  %3017 = vmatprep.subr.bf16.mxu1 %v3412_v3  ;;  %v3461_v50 = vld [vmem:[#allocation4 + $0x1a0] ss:$48 sps:$4 sm:$0xff]  }
  0xa6   :  { %1773 = vmatmul.mubr.bf16.gmra.mxu1 %v3370_v52  ;;  %1683 = vmatprep.mubr.bf16.mxu0 %v3371_v53  ;;  %v3463_v52 = vld [vmem:[#allocation4 + $0x204] ss:$48 sps:$4 sm:$0xff]   ;;  %v3465_v53 = vld [vmem:[#allocation4 + $0x20c] ss:$48 sps:$4 sm:$0xff]  }
  0xa7   :  { %1780 = vmatprep.mubr.bf16.mxu1 %v3373_v55  ;;  %2954 = vmatpush3.bf16.msra.mxu0 %v3413_v4  ;;  %v3468_v55 = vld [vmem:[#allocation4 + $0x208] ss:$48 sps:$4 sm:$0xff]  }
  0xa8   :  { %3018 = vmatpush3.bf16.msra.mxu1 %v3414_v5  ;;  %2955 = vmatprep.subr.bf16.mxu0 %v3415_v6 }
  0xa9   :  { %3019 = vmatprep.subr.bf16.mxu1 %v3416_v7 }
  0xab   :  { %2956 = vmatpush3.bf16.msra.mxu0 %v3417_v9 }
  0xac   :  { %3020 = vmatpush3.bf16.msra.mxu1 %v3418_v10  ;;  %2957 = vmatprep.subr.bf16.mxu0 %v3425_v14 }
  0xad   :  { %1684 = vmatmul.mubr.bf16.gmra.mxu0 %v3375_v62  ;;  %3021 = vmatprep.subr.bf16.mxu1 %v3426_v15  ;;  %v3479_v62 = vld [vmem:[#allocation4 + $0x2c0] ss:$48 sps:$4 sm:$0xff]  }
  0xae   :  { %1781 = vmatmul.mubr.bf16.gmra.mxu1 %v3376_v63  ;;  %1691 = vmatprep.mubr.bf16.mxu0 %v3377_v0  ;;  %v3480_v63 = vld [vmem:[#allocation4 + $0x2c8] ss:$48 sps:$4 sm:$0xff]  }
  0xaf   :  { %1788 = vmatprep.mubr.bf16.mxu1 %v3379_v1  ;;  %2958 = vmatpush3.bf16.msra.mxu0 %v3427_v16 }
  0xb0   :  { %3022 = vmatpush3.bf16.msra.mxu1 %v3428_v18  ;;  %2959 = vmatprep.subr.bf16.mxu0 %v3429_v21 }
  0xb1   :  { %3023 = vmatprep.subr.bf16.mxu1 %v3430_v23 }
  0xb3   :  { %2960 = vmatpush3.bf16.msra.mxu0 %v3431_v24 }
  0xb4   :  { %3024 = vmatpush3.bf16.msra.mxu1 %v3432_v25 }
  0xb5   :  { %1692 = vmatmul.mubr.bf16.gmra.mxu0 %v3381_v8 }
  0xb6   :  { %1789 = vmatmul.mubr.bf16.gmra.mxu1 %v3382_v11  ;;  %1699 = vmatprep.mubr.bf16.mxu0 %v3391_v12 }
  0xb7   :  { %1796 = vmatprep.mubr.bf16.mxu1 %v3393_v13 }
  0xbd   :  { %1700 = vmatmul.mubr.bf16.gmra.mxu0 %v3395_v17 }
  0xbe   :  { %1797 = vmatmul.mubr.bf16.gmra.mxu1 %v3396_v19  ;;  %1707 = vmatprep.mubr.bf16.mxu0 %v3405_v20 }
  0xbf   :  { %1804 = vmatprep.mubr.bf16.mxu1 %v3407_v22 }
  0xc5   :  { %1708 = vmatmul.mubr.bf16.gmra.mxu0 %v3409_v26 }
  0xc6   :  { %1805 = vmatmul.mubr.bf16.gmra.mxu1 %v3410_v27  ;;  %1715 = vmatprep.mubr.bf16.mxu0 %v3419_v28 }
  0xc7   :  { %1812 = vmatprep.mubr.bf16.mxu1 %v3421_v29 }
  0xcd   :  { %1716 = vmatmul.mubr.bf16.gmra.mxu0 %v3423_v30 }
  0xce   :  { %1813 = vmatmul.mubr.bf16.gmra.mxu1 %v3424_v31  ;;  %1853 = vmatprep.mubr.bf16.mxu0 %v3435_v32 }
  0xcf   :  { %1950 = vmatprep.mubr.bf16.mxu1 %v3438_v33 }
  0xd5   :  { %1854 = vmatmul.mubr.bf16.vlgmr.msra.gmra.mxu0 %v3433_v34 }
  0xd6   :  { %1951 = vmatmul.mubr.bf16.vlgmr.msra.gmra.mxu1 %v3436_v35  ;;  %1861 = vmatprep.mubr.bf16.mxu0 %v3439_v36 }
  0xd7   :  { %1958 = vmatprep.mubr.bf16.mxu1 %v3441_v37 }
  0xdd   :  { %1862 = vmatmul.mubr.bf16.gmra.mxu0 %v3443_v38 }
  0xde   :  { %1959 = vmatmul.mubr.bf16.gmra.mxu1 %v3444_v39  ;;  %1869 = vmatprep.mubr.bf16.mxu0 %v3445_v40 }
  0xdf   :  { %1966 = vmatprep.mubr.bf16.mxu1 %v3447_v41 }
  0xe5   :  { %1870 = vmatmul.mubr.bf16.gmra.mxu0 %v3449_v42 }
  0xe6   :  { %1967 = vmatmul.mubr.bf16.gmra.mxu1 %v3450_v43  ;;  %1877 = vmatprep.mubr.bf16.mxu0 %v3451_v44 }
  0xe7   :  { %1974 = vmatprep.mubr.bf16.mxu1 %v3453_v45 }
  0xed   :  { %1878 = vmatmul.mubr.bf16.gmra.mxu0 %v3455_v46 }
  0xee   :  { %1975 = vmatmul.mubr.bf16.gmra.mxu1 %v3456_v47  ;;  %1885 = vmatprep.mubr.bf16.mxu0 %v3457_v48 }
  0xef   :  { %1982 = vmatprep.mubr.bf16.mxu1 %v3459_v49 }
  0xf5   :  { %1886 = vmatmul.mubr.bf16.gmra.mxu0 %v3461_v50 }
  0xf6   :  { %1983 = vmatmul.mubr.bf16.gmra.mxu1 %v3462_v51  ;;  %1893 = vmatprep.mubr.bf16.mxu0 %v3463_v52 }
  0xf7   :  { %1990 = vmatprep.mubr.bf16.mxu1 %v3465_v53 }
  0xfd   :  { %1894 = vmatmul.mubr.bf16.gmra.mxu0 %v3467_v54 }
  0xfe   :  { %1991 = vmatmul.mubr.bf16.gmra.mxu1 %v3468_v55  ;;  %1901 = vmatprep.mubr.bf16.mxu0 %v3469_v56 }
  0xff   :  { %1998 = vmatprep.mubr.bf16.mxu1 %v3471_v57 }
 0x105   :  { %1902 = vmatmul.mubr.bf16.gmra.mxu0 %v3473_v58 }
 0x106   :  { %1999 = vmatmul.mubr.bf16.gmra.mxu1 %v3474_v59  ;;  %1909 = vmatprep.mubr.bf16.mxu0 %v3475_v60 }
 0x107   :  { %2006 = vmatprep.mubr.bf16.mxu1 %v3477_v61 }
 0x10d   :  { %1910 = vmatmul.mubr.bf16.gmra.mxu0 %v3479_v62 }
 0x10e   :  { %2007 = vmatmul.mubr.bf16.gmra.mxu1 %v3480_v63 }
 0x115   :  { %v2705_v0 = vpop.f32.mrf.mxu0 }
 0x116   :  { %v2769_v1 = vpop.f32.mrf.mxu1 }
 0x117   :  { %v2706_v2 = vpop.f32.mrf.mxu0 }
 0x118   :  { %v2707_v3 = vadd.f32 %v2706_v2, %v2705_v0  ;;  %v2770_v4 = vpop.f32.mrf.mxu1 }
 0x119   :  { %v2771_v5 = vadd.f32 %v2770_v4, %v2769_v1  ;;  %v2708_v6 = vpop.f32.mrf.mxu0 }
 0x11a   :  { %v2772_v7 = vpop.f32.mrf.mxu1 }
 0x11b   :  { %v3628_v8 = vadd.f32 %v2771_v5, %v2707_v3  ;;  %v2709_v9 = vpop.f32.mrf.mxu0 }
 0x11c   :  { %v2710_v10 = vadd.f32 %v2709_v9, %v2708_v6  ;;  %v2773_v11 = vpop.f32.mrf.mxu1 }
 0x11d   :  { %v2774_v12 = vadd.f32 %v2773_v11, %v2772_v7  ;;  %v2711_v13 = vpop.f32.mrf.mxu0 }
 0x11e   :  { %v2775_v14 = vpop.f32.mrf.mxu1 }
 0x11f   :  { %v3630_v15 = vadd.f32 %v2774_v12, %v2710_v10  ;;  %v2712_v16 = vpop.f32.mrf.mxu0 }
 0x120   :  { %v2713_v17 = vadd.f32 %v2712_v16, %v2711_v13  ;;  %v2776_v18 = vpop.f32.mrf.mxu1 }
 0x121   :  { %v2777_v19 = vadd.f32 %v2776_v18, %v2775_v14  ;;  %v2714_v20 = vpop.f32.mrf.mxu0 }
 0x122   :  { %v2778_v21 = vpop.f32.mrf.mxu1 }
 0x123   :  { %v3632_v22 = vadd.f32 %v2777_v19, %v2713_v17  ;;  %v2715_v23 = vpop.f32.mrf.mxu0 }
 0x124   :  { %v2716_v24 = vadd.f32 %v2715_v23, %v2714_v20  ;;  %v2779_v25 = vpop.f32.mrf.mxu1 }
 0x125   :  { %v2780_v26 = vadd.f32 %v2779_v25, %v2778_v21  ;;  %v2717_v27 = vpop.f32.mrf.mxu0 }
 0x126   :  { %v2781_v28 = vpop.f32.mrf.mxu1 }
 0x127   :  { %v3634_v29 = vadd.f32 %v2780_v26, %v2716_v24  ;;  %v2718_v30 = vpop.f32.mrf.mxu0 }
 0x128   :  { %v2719_v31 = vadd.f32 %v2718_v30, %v2717_v27  ;;  %v2782_v32 = vpop.f32.mrf.mxu1 }
 0x129   :  { %v2783_v33 = vadd.f32 %v2782_v32, %v2781_v28  ;;  %v2720_v34 = vpop.f32.mrf.mxu0 }
 0x12a   :  { %v2784_v35 = vpop.f32.mrf.mxu1 }
 0x12b   :  { %v3636_v36 = vadd.f32 %v2783_v33, %v2719_v31  ;;  %v2721_v37 = vpop.f32.mrf.mxu0 }
 0x12c   :  { %v2722_v38 = vadd.f32 %v2721_v37, %v2720_v34  ;;  %v2785_v39 = vpop.f32.mrf.mxu1 }
 0x12d   :  { %v2786_v40 = vadd.f32 %v2785_v39, %v2784_v35  ;;  %v2723_v41 = vpop.f32.mrf.mxu0 }
 0x12e   :  { %v2787_v42 = vpop.f32.mrf.mxu1 }
 0x12f   :  { %v3638_v43 = vadd.f32 %v2786_v40, %v2722_v38  ;;  %v2724_v44 = vpop.f32.mrf.mxu0 }
 0x130   :  { %v2725_v45 = vadd.f32 %v2724_v44, %v2723_v41  ;;  %v2788_v46 = vpop.f32.mrf.mxu1 }
 0x131   :  { %v2789_v47 = vadd.f32 %v2788_v46, %v2787_v42  ;;  %v2726_v48 = vpop.f32.mrf.mxu0 }
 0x132   :  { %v2790_v49 = vpop.f32.mrf.mxu1 }
 0x133   :  { %v3640_v50 = vadd.f32 %v2789_v47, %v2725_v45  ;;  %v2727_v51 = vpop.f32.mrf.mxu0 }
 0x134   :  { %v2728_v52 = vadd.f32 %v2727_v51, %v2726_v48  ;;  %v2791_v53 = vpop.f32.mrf.mxu1 }
 0x135   :  { %v2792_v54 = vadd.f32 %v2791_v53, %v2790_v49  ;;  %v2729_v55 = vpop.f32.mrf.mxu0 }
 0x136   :  { %v2793_v56 = vpop.f32.mrf.mxu1 }
 0x137   :  { %v3642_v57 = vadd.f32 %v2792_v54, %v2728_v52  ;;  %v2730_v58 = vpop.f32.mrf.mxu0 }
 0x138   :  { %v2731_v59 = vadd.f32 %v2730_v58, %v2729_v55  ;;  %v2794_v60 = vpop.f32.mrf.mxu1 }
 0x139   :  { %v2795_v61 = vadd.f32 %v2794_v60, %v2793_v56  ;;  %v2732_v62 = vpop.f32.mrf.mxu0 }
 0x13a   :  { %v2796_v63 = vpop.f32.mrf.mxu1 }
 0x13b   :  { %v3644_v0 = vadd.f32 %v2795_v61, %v2731_v59  ;;  %v2733_v1 = vpop.f32.mrf.mxu0 }
 0x13c   :  { %v2734_v2 = vadd.f32 %v2733_v1, %v2732_v62  ;;  %v2797_v3 = vpop.f32.mrf.mxu1 }
 0x13d   :  { %v2798_v4 = vadd.f32 %v2797_v3, %v2796_v63  ;;  %v2735_v5 = vpop.f32.mrf.mxu0 }
 0x13e   :  { %v2799_v6 = vpop.f32.mrf.mxu1 }
 0x13f   :  { %v3646_v7 = vadd.f32 %v2798_v4, %v2734_v2  ;;  %v2736_v9 = vpop.f32.mrf.mxu0 }
 0x140   :  { %v2737_v10 = vadd.f32 %v2736_v9, %v2735_v5  ;;  %v2800_v11 = vpop.f32.mrf.mxu1 }
 0x141   :  { %v2801_v12 = vadd.f32 %v2800_v11, %v2799_v6  ;;  %v2738_v13 = vpop.f32.mrf.mxu0 }
 0x142   :  { %v2802_v14 = vpop.f32.mrf.mxu1 }
 0x143   :  { %v3648_v16 = vadd.f32 %v2801_v12, %v2737_v10  ;;  %v2739_v17 = vpop.f32.mrf.mxu0 }
 0x144   :  { %v2740_v18 = vadd.f32 %v2739_v17, %v2738_v13  ;;  %v2803_v19 = vpop.f32.mrf.mxu1 }
 0x145   :  { %v2804_v20 = vadd.f32 %v2803_v19, %v2802_v14  ;;  %v2741_v21 = vpop.f32.mrf.mxu0 }
 0x146   :  { %v2805_v23 = vpop.f32.mrf.mxu1 }
 0x147   :  { %v3650_v24 = vadd.f32 %v2804_v20, %v2740_v18  ;;  %v2742_v25 = vpop.f32.mrf.mxu0 }
 0x148   :  { %v2743_v26 = vadd.f32 %v2742_v25, %v2741_v21  ;;  %v2806_v27 = vpop.f32.mrf.mxu1 }
 0x149   :  { %v2807_v28 = vadd.f32 %v2806_v27, %v2805_v23  ;;  %v2744_v30 = vpop.f32.mrf.mxu0 }
 0x14a   :  { %v2808_v31 = vpop.f32.mrf.mxu1 }
 0x14b   :  { %v3652_v32 = vadd.f32 %v2807_v28, %v2743_v26  ;;  %v2745_v33 = vpop.f32.mrf.mxu0 }
 0x14c   :  { %v2746_v34 = vadd.f32 %v2745_v33, %v2744_v30  ;;  %v2809_v35 = vpop.f32.mrf.mxu1 }
 0x14d   :  { %v2810_v37 = vadd.f32 %v2809_v35, %v2808_v31  ;;  %v2747_v38 = vpop.f32.mrf.mxu0 }
 0x14e   :  { %v2811_v39 = vpop.f32.mrf.mxu1 }
 0x14f   :  { %v3654_v40 = vadd.f32 %v2810_v37, %v2746_v34  ;;  %v2748_v41 = vpop.f32.mrf.mxu0 }
 0x150   :  { %v2749_v42 = vadd.f32 %v2748_v41, %v2747_v38  ;;  %v2812_v44 = vpop.f32.mrf.mxu1 }
 0x151   :  { %v2813_v45 = vadd.f32 %v2812_v44, %v2811_v39  ;;  %v2750_v46 = vpop.f32.mrf.mxu0 }
 0x152   :  { %v2814_v47 = vpop.f32.mrf.mxu1 }
 0x153   :  { %v3656_v48 = vadd.f32 %v2813_v45, %v2749_v42  ;;  %v2751_v49 = vpop.f32.mrf.mxu0 }
 0x154   :  { %v2752_v51 = vadd.f32 %v2751_v49, %v2750_v46  ;;  %v2815_v52 = vpop.f32.mrf.mxu1 }
 0x155   :  { %v2816_v53 = vadd.f32 %v2815_v52, %v2814_v47  ;;  %v2833_v54 = vpop.f32.mrf.mxu0 }
 0x156   :  { %v2897_v55 = vpop.f32.mrf.mxu1 }
 0x157   :  { %v3658_v56 = vadd.f32 %v2816_v53, %v2752_v51  ;;  %v2834_v58 = vpop.f32.mrf.mxu0 }
 0x158   :  { %v2835_v59 = vadd.f32 %v2834_v58, %v2833_v54  ;;  %v2898_v60 = vpop.f32.mrf.mxu1 }
 0x159   :  { %v2899_v61 = vadd.f32 %v2898_v60, %v2897_v55  ;;  %v2836_v62 = vpop.f32.mrf.mxu0 }
 0x15a   :  { %v1662_v63 = vadd.f32 %v2835_v59, %v3628_v8  ;;  %v2900_v1 = vpop.f32.mrf.mxu1 }
 0x15b   :  { %v2837_v2 = vpop.f32.mrf.mxu0 }
 0x15c   :  { %v3661_v3 = vadd.f32 %v2899_v61, %v1662_v63  ;;  %v2838_v4 = vadd.f32 %v2837_v2, %v2836_v62  ;;  %v2901_v5 = vpop.f32.mrf.mxu1 }
 0x15d   :  { %v2902_v6 = vadd.f32 %v2901_v5, %v2900_v1  ;;  %v2839_v9 = vpop.f32.mrf.mxu0 }
 0x15e   :  { %v1665_v10 = vadd.f32 %v2838_v4, %v3630_v15  ;;  %v2903_v11 = vpop.f32.mrf.mxu1 }
 0x15f   :  { %v2840_v12 = vpop.f32.mrf.mxu0 }
 0x160   :  { %v3664_v13 = vadd.f32 %v2902_v6, %v1665_v10  ;;  %v2841_v14 = vadd.f32 %v2840_v12, %v2839_v9  ;;  %v2904_v17 = vpop.f32.mrf.mxu1 }
 0x161   :  { %v2905_v18 = vadd.f32 %v2904_v17, %v2903_v11  ;;  %v2842_v19 = vpop.f32.mrf.mxu0 }
 0x162   :  { %v1670_v8 = vadd.f32 %v2841_v14, %v3632_v22  ;;  %v2906_v20 = vpop.f32.mrf.mxu1  ;;  %v3684_v14 = vld [vmem:[#allocation2] sm:$0xff]  }
 0x163   :  { %v2843_v21 = vpop.f32.mrf.mxu0  ;;  %3137 = vmatprep.mubr.bf16.mxu0 %v3684_v14 }
 0x164   :  { %v3667_v23 = vadd.f32 %v2905_v18, %v1670_v8  ;;  %v2844_v25 = vadd.f32 %v2843_v21, %v2842_v19  ;;  %v2907_v26 = vpop.f32.mrf.mxu1 }
 0x165   :  { %v2908_v27 = vadd.f32 %v2907_v26, %v2906_v20  ;;  %v2845_v28 = vpop.f32.mrf.mxu0 }
 0x166   :  { %v1673_v15 = vadd.f32 %v2844_v25, %v3634_v29  ;;  %v2909_v30 = vpop.f32.mrf.mxu1 }
 0x167   :  { %v2846_v31 = vpop.f32.mrf.mxu0 }
 0x168   :  { %v3670_v33 = vadd.f32 %v2908_v27, %v1673_v15  ;;  %v2847_v34 = vadd.f32 %v2846_v31, %v2845_v28  ;;  %v2910_v35 = vpop.f32.mrf.mxu1 }
 0x169   :  { %v2911_v37 = vadd.f32 %v2910_v35, %v2909_v30  ;;  %v2848_v38 = vpop.f32.mrf.mxu0 }
 0x16a   :  { %v1678_v22 = vadd.f32 %v2847_v34, %v3636_v36  ;;  %v2912_v39 = vpop.f32.mrf.mxu1 }
 0x16b   :  { %v2849_v41 = vpop.f32.mrf.mxu0 }
 0x16c   :  { %v3673_v42 = vadd.f32 %v2911_v37, %v1678_v22  ;;  %v2850_v44 = vadd.f32 %v2849_v41, %v2848_v38  ;;  %v2913_v45 = vpop.f32.mrf.mxu1 }
 0x16d   :  { %v2914_v46 = vadd.f32 %v2913_v45, %v2912_v39  ;;  %v2851_v47 = vpop.f32.mrf.mxu0 }
 0x16e   :  { %v1681_v29 = vadd.f32 %v2850_v44, %v3638_v43  ;;  %v2915_v49 = vpop.f32.mrf.mxu1 }
 0x16f   :  { %v2852_v51 = vpop.f32.mrf.mxu0 }
 0x170   :  { %v3676_v52 = vadd.f32 %v2914_v46, %v1681_v29  ;;  %v2853_v53 = vadd.f32 %v2852_v51, %v2851_v47  ;;  %v2916_v54 = vpop.f32.mrf.mxu1 }
 0x171   :  { %v2917_v55 = vadd.f32 %v2916_v54, %v2915_v49  ;;  %v2854_v58 = vpop.f32.mrf.mxu0 }
 0x172   :  { %v1686_v36 = vadd.f32 %v2853_v53, %v3640_v50  ;;  %v2918_v59 = vpop.f32.mrf.mxu1 }
 0x173   :  { %v2855_v60 = vpop.f32.mrf.mxu0 }
 0x174   :  { %v3679_v61 = vadd.f32 %v2917_v55, %v1686_v36  ;;  %v2856_v62 = vadd.f32 %v2855_v60, %v2854_v58  ;;  %v2919_v63 = vpop.f32.mrf.mxu1 }
 0x175   :  { %v2920_v1 = vadd.f32 %v2919_v63, %v2918_v59  ;;  %v2857_v2 = vpop.f32.mrf.mxu0 }
 0x176   :  { %v1689_v43 = vadd.f32 %v2856_v62, %v3642_v57  ;;  %v2921_v4 = vpop.f32.mrf.mxu1 }
 0x177   :  { %v2858_v5 = vpop.f32.mrf.mxu0 }
 0x178   :  { %v3682_v6 = vadd.f32 %v2920_v1, %v1689_v43  ;;  %v2859_v9 = vadd.f32 %v2858_v5, %v2857_v2  ;;  %v2922_v10 = vpop.f32.mrf.mxu1 }
 0x179   :  { %v2923_v11 = vadd.f32 %v2922_v10, %v2921_v4  ;;  %v2860_v12 = vpop.f32.mrf.mxu0 }
 0x17a   :  { %v1694_v50 = vadd.f32 %v2859_v9, %v3644_v0  ;;  %v2924_v17 = vpop.f32.mrf.mxu1 }
 0x17b   :  { %v2861_v18 = vpop.f32.mrf.mxu0 }
 0x17c   :  { %v3688_v19 = vadd.f32 %v2923_v11, %v1694_v50  ;;  %v2862_v8 = vadd.f32 %v2861_v18, %v2860_v12  ;;  %v2925_v57 = vpop.f32.mrf.mxu1 }
 0x17d   :  { %v2926_v20 = vadd.f32 %v2925_v57, %v2924_v17  ;;  %v2863_v21 = vpop.f32.mrf.mxu0  ;;  %v3490_v17 = vld [vmem:[#allocation7 + $0x30] sm:$0xff]  }
 0x17e   :  { %v1697_v25 = vadd.f32 %v2862_v8, %v3646_v7  ;;  %v2927_v26 = vpop.f32.mrf.mxu1 }
 0x17f   :  { %v2864_v27 = vpop.f32.mrf.mxu0 }
 0x180   :  { %v3691_v28 = vadd.f32 %v2926_v20, %v1697_v25  ;;  %v2865_v15 = vadd.f32 %v2864_v27, %v2863_v21  ;;  %v2928_v30 = vpop.f32.mrf.mxu1  ;;  %v3491_v25 = vld [vmem:[#allocation7 + $0x28] sm:$0xff]  }
 0x181   :  { %v2929_v31 = vadd.f32 %v2928_v30, %v2927_v26  ;;  %v2866_v0 = vpop.f32.mrf.mxu0 }
 0x182   :  { %v1702_v34 = vadd.f32 %v2865_v15, %v3648_v16  ;;  %v2930_v35 = vpop.f32.mrf.mxu1 }
 0x183   :  { %v2867_v37 = vpop.f32.mrf.mxu0 }
 0x184   :  { %v3694_v38 = vadd.f32 %v2929_v31, %v1702_v34  ;;  %v2868_v22 = vadd.f32 %v2867_v37, %v2866_v0  ;;  %v2931_v39 = vpop.f32.mrf.mxu1 }
 0x185   :  { %v2932_v41 = vadd.f32 %v2931_v39, %v2930_v35  ;;  %v2869_v44 = vpop.f32.mrf.mxu0  ;;  %v3492_v35 = vld [vmem:[#allocation7 + $0x20] sm:$0xff]  }
 0x186   :  { %v1705_v7 = vadd.f32 %v2868_v22, %v3650_v24  ;;  %v2933_v45 = vpop.f32.mrf.mxu1 }
 0x187   :  { %v2870_v46 = vpop.f32.mrf.mxu0 }
 0x188   :  { %v3697_v47 = vadd.f32 %v2932_v41, %v1705_v7  ;;  %v2871_v29 = vadd.f32 %v2870_v46, %v2869_v44  ;;  %v2934_v49 = vpop.f32.mrf.mxu1 }
 0x189   :  { %v2935_v51 = vadd.f32 %v2934_v49, %v2933_v45  ;;  %v2872_v53 = vpop.f32.mrf.mxu0 }
 0x18a   :  { %v1710_v16 = vadd.f32 %v2871_v29, %v3652_v32  ;;  %v2936_v54 = vpop.f32.mrf.mxu1 }
 0x18b   :  { %v2873_v55 = vpop.f32.mrf.mxu0 }
 0x18c   :  { %v3700_v58 = vadd.f32 %v2935_v51, %v1710_v16  ;;  %v2874_v36 = vadd.f32 %v2873_v55, %v2872_v53  ;;  %v2937_v59 = vpop.f32.mrf.mxu1 }
 0x18d   :  { %v2938_v60 = vadd.f32 %v2937_v59, %v2936_v54  ;;  %v2875_v62 = vpop.f32.mrf.mxu0 }
 0x18e   :  { %v1713_v24 = vadd.f32 %v2874_v36, %v3654_v40  ;;  %v2939_v63 = vpop.f32.mrf.mxu1  ;;  %v3489_v40 = vld [vmem:[#allocation7 + $0x38] sm:$0xff]  }
 0x18f   :  { %v2876_v1 = vpop.f32.mrf.mxu0  ;;  %3153 = vmatprep.subr.bf16.mxu1 %v3489_v40 }
 0x190   :  { %v3703_v2 = vadd.f32 %v2938_v60, %v1713_v24  ;;  %v2877_v43 = vadd.f32 %v2876_v1, %v2875_v62  ;;  %v2940_v4 = vpop.f32.mrf.mxu1  ;;  %3154 = vmatpush3.bf16.msra.mxu1 %v3489_v40 }
 0x191   :  { %v2941_v5 = vadd.f32 %v2940_v4, %v2939_v63  ;;  %v3705_v9 = vpop.f32.mrf.mxu0  ;;  %3155 = vmatprep.subr.bf16.mxu1 %v3490_v17 }
 0x192   :  { %v1718_v32 = vadd.f32 %v2877_v43, %v3656_v48  ;;  %v3708_v10 = vpop.f32.mrf.mxu1 }
 0x193   :  { %v3710_v11 = vpop.f32.mrf.mxu0 }
 0x194   :  { %v3712_v12 = vadd.f32 %v2941_v5, %v1718_v32  ;;  %v3714_v50 = vpop.f32.mrf.mxu1  ;;  %3156 = vmatpush3.bf16.msra.mxu1 %v3490_v17 }
 0x195   :  { %v2961_v18 = vpop.f32.mrf.mxu0  ;;  %3157 = vmatprep.subr.bf16.mxu1 %v3491_v25 }
 0x196   :  { %v3025_v8 = vpop.f32.mrf.mxu1 }
 0x197   :  { %v2962_v57 = vpop.f32.mrf.mxu0 }
 0x198   :  { %v2963_v20 = vadd.f32 %v2962_v57, %v2961_v18  ;;  %v3026_v21 = vpop.f32.mrf.mxu1  ;;  %3158 = vmatpush3.bf16.msra.mxu1 %v3491_v25 }
 0x199   :  { %v3027_v48 = vadd.f32 %v3026_v21, %v3025_v8  ;;  %v2964_v26 = vpop.f32.mrf.mxu0  ;;  %3159 = vmatprep.subr.bf16.mxu1 %v3492_v35 }
 0x19a   :  { %v1856_v27 = vadd.f32 %v2963_v20, %v3661_v3  ;;  %v3028_v15 = vpop.f32.mrf.mxu1  ;;  %v3493_v3 = vld [vmem:[#allocation7 + $0x18] sm:$0xff]  }
 0x19b   :  { %v2965_v30 = vpop.f32.mrf.mxu0 }
 0x19c   :  { %v1953_v31 = vadd.f32 %v3027_v48, %v1856_v27  ;;  %v2966_v0 = vadd.f32 %v2965_v30, %v2964_v26  ;;  %v3029_v34 = vpop.f32.mrf.mxu1  ;;  %3160 = vmatpush3.bf16.msra.mxu1 %v3492_v35 }
 0x19d   :  { %v3030_v37 = vadd.f32 %v3029_v34, %v3028_v15  ;;  %v2967_v22 = vpop.f32.mrf.mxu0  ;;  %3161 = vmatprep.subr.bf16.mxu1 %v3493_v3 }
 0x19e   :  { %v1859_v39 = vadd.f32 %v2966_v0, %v3664_v13  ;;  %v3031_v41 = vpop.f32.mrf.mxu1 }
 0x19f   :  { %v2968_v44 = vpop.f32.mrf.mxu0 }
 0x1a0   :  { %v1956_v7 = vadd.f32 %v3030_v37, %v1859_v39  ;;  %v2969_v45 = vadd.f32 %v2968_v44, %v2967_v22  ;;  %v3032_v46 = vpop.f32.mrf.mxu1  ;;  %3162 = vmatpush3.bf16.msra.mxu1 %v3493_v3 }
 0x1a1   :  { %v3033_v29 = vadd.f32 %v3032_v46, %v3031_v41  ;;  %v2970_v49 = vpop.f32.mrf.mxu0 }
 0x1a2   :  { %v1864_v51 = vadd.f32 %v2969_v45, %v3667_v23  ;;  %v3034_v53 = vpop.f32.mrf.mxu1  ;;  %v3719_v16 = vpack.c.bf16 %v1956_v7, %v1953_v31 }
 0x1a3   :  { %v2971_v54 = vpop.f32.mrf.mxu0 }
 0x1a4   :  { %v1961_v55 = vadd.f32 %v3033_v29, %v1864_v51  ;;  %v2972_v36 = vadd.f32 %v2971_v54, %v2970_v49  ;;  %v3035_v13 = vpop.f32.mrf.mxu1 }
 0x1a5   :  { %v3036_v59 = vadd.f32 %v3035_v13, %v3034_v53  ;;  %v2973_v60 = vpop.f32.mrf.mxu0 }
 0x1a6   :  { %v1867_v62 = vadd.f32 %v2972_v36, %v3670_v33  ;;  %v3037_v24 = vpop.f32.mrf.mxu1 }
 0x1a7   :  { %v2974_v63 = vpop.f32.mrf.mxu0 }
 0x1a8   :  { %v1964_v1 = vadd.f32 %v3036_v59, %v1867_v62  ;;  %v2975_v43 = vadd.f32 %v2974_v63, %v2973_v60  ;;  %v3038_v4 = vpop.f32.mrf.mxu1 }
 0x1a9   :  { %v2976_v23 = vpop.f32.mrf.mxu0  ;;  %v3039_v32 = vadd.f32 %v3038_v4, %v3037_v24 }
 0x1aa   :  { %v1872_v5 = vadd.f32 %v2975_v43, %v3673_v42  ;;  %v3040_v40 = vpop.f32.mrf.mxu1  ;;  %v3723_v17 = vpack.c.bf16 %v1964_v1, %v1961_v55 }
 0x1ab   :  { %v2977_v18 = vpop.f32.mrf.mxu0 }
 0x1ac   :  { %v1969_v8 = vadd.f32 %v3039_v32, %v1872_v5  ;;  %v2978_v57 = vadd.f32 %v2977_v18, %v2976_v23  ;;  %v3041_v20 = vpop.f32.mrf.mxu1 }
 0x1ad   :  { %v2979_v21 = vpop.f32.mrf.mxu0  ;;  %v3042_v25 = vadd.f32 %v3041_v20, %v3040_v40 }
 0x1ae   :  { %v1875_v33 = vadd.f32 %v2978_v57, %v3676_v52  ;;  %v3043_v48 = vpop.f32.mrf.mxu1 }
 0x1af   :  { %v2980_v26 = vpop.f32.mrf.mxu0 }
 0x1b0   :  { %v1972_v27 = vadd.f32 %v3042_v25, %v1875_v33  ;;  %v2981_v15 = vadd.f32 %v2980_v26, %v2979_v21  ;;  %v3044_v30 = vpop.f32.mrf.mxu1 }
 0x1b1   :  { %v2982_v31 = vpop.f32.mrf.mxu0  ;;  %v3045_v41 = vadd.f32 %v3044_v30, %v3043_v48 }
 0x1b2   :  { %v3046_v0 = vpop.f32.mrf.mxu1  ;;  %v3726_v42 = vpack.c.bf16 %v1972_v27, %v1969_v8  ;;  %v1880_v35 = vadd.f32 %v2981_v15, %v3679_v61 }
 0x1b3   :  { %v2983_v34 = vpop.f32.mrf.mxu0 }
 0x1b4   :  { %v2984_v37 = vadd.f32 %v2983_v34, %v2982_v31  ;;  %v3047_v22 = vpop.f32.mrf.mxu1  ;;  %v1977_v46 = vadd.f32 %v3045_v41, %v1880_v35 }
 0x1b5   :  { %v2985_v39 = vpop.f32.mrf.mxu0  ;;  %v3048_v52 = vadd.f32 %v3047_v22, %v3046_v0 }
 0x1b6   :  { %v1883_v44 = vadd.f32 %v2984_v37, %v3682_v6  ;;  %v3049_v7 = vpop.f32.mrf.mxu1 }
 0x1b7   :  { %v2986_v45 = vpop.f32.mrf.mxu0 }
 0x1b8   :  { %v1980_v3 = vadd.f32 %v3048_v52, %v1883_v44  ;;  %v2987_v29 = vadd.f32 %v2986_v45, %v2985_v39  ;;  %v3050_v49 = vpop.f32.mrf.mxu1 }
 0x1b9   :  { %v2988_v51 = vpop.f32.mrf.mxu0  ;;  %v3051_v60 = vadd.f32 %v3050_v49, %v3049_v7 }
 0x1ba   :  { %v3052_v53 = vpop.f32.mrf.mxu1  ;;  %v3730_v54 = vpack.c.bf16 %v1980_v3, %v1977_v46  ;;  %v1888_v61 = vadd.f32 %v2987_v29, %v3688_v19 }
 0x1bb   :  { %v2989_v55 = vpop.f32.mrf.mxu0 }
 0x1bc   :  { %v2990_v36 = vadd.f32 %v2989_v55, %v2988_v51  ;;  %v3053_v13 = vpop.f32.mrf.mxu1  ;;  %v1985_v1 = vadd.f32 %v3051_v60, %v1888_v61 }
 0x1bd   :  { %v2991_v59 = vpop.f32.mrf.mxu0  ;;  %v3054_v62 = vadd.f32 %v3053_v13, %v3052_v53 }
 0x1be   :  { %v1891_v6 = vadd.f32 %v2990_v36, %v3691_v28  ;;  %v3055_v24 = vpop.f32.mrf.mxu1 }
 0x1bf   :  { %v2992_v63 = vpop.f32.mrf.mxu0 }
 0x1c0   :  { %v1988_v43 = vadd.f32 %v3054_v62, %v1891_v6  ;;  %v2993_v4 = vadd.f32 %v2992_v63, %v2991_v59  ;;  %v3056_v23 = vpop.f32.mrf.mxu1  ;;  %v3494_v63 = vld [vmem:[#allocation7 + $0x10] sm:$0xff]  }
 0x1c1   :  { %v2994_v5 = vpop.f32.mrf.mxu0  ;;  %v3057_v21 = vadd.f32 %v3056_v23, %v3055_v24  ;;  %3163 = vmatprep.subr.bf16.mxu1 %v3494_v63 }
 0x1c2   :  { %v3058_v32 = vpop.f32.mrf.mxu1  ;;  %v2019_v40 = vpack.c.bf16 %v1988_v43, %v1985_v1  ;;  %v1896_v8 = vadd.f32 %v2993_v4, %v3694_v38  ;;  %v2880_v38 = vadd.f32 %v3710_v11, %v3705_v9  ;;  %v2944_v9 = vadd.f32 %v3714_v50, %v3708_v10  ;;  %v3751_v10 = vld [vmem:[#allocation2 + $0x8] sm:$0xff]   ;;  %v3758_v50 = vld [vmem:[#allocation2 + $0x18] sm:$0xff]   ;;  %3164 = vmatpush3.bf16.msra.mxu1 %v3494_v63  ;;  %v3496_v43 = vld [vmem:[#allocation7] sm:$0xff]  }
 0x1c3   :  { %v2995_v18 = vpop.f32.mrf.mxu0  ;;  %v3495_v1 = vld [vmem:[#allocation7 + $0x8] sm:$0xff]  }
 0x1c4   :  { %v2996_v19 = vadd.f32 %v2995_v18, %v2994_v5  ;;  %v3059_v57 = vpop.f32.mrf.mxu1  ;;  %v1993_v26 = vadd.f32 %v3057_v21, %v1896_v8  ;;  %v1721_v46 = vadd.f32 %v2880_v38, %v3658_v56  ;;  %3165 = vmatprep.subr.bf16.mxu1 %v3495_v1 }
 0x1c5   :  { %v2997_v20 = vpop.f32.mrf.mxu0  ;;  %v3060_v28 = vadd.f32 %v3059_v57, %v3058_v32 }
 0x1c6   :  { %v1899_v33 = vadd.f32 %v2996_v19, %v3697_v47  ;;  %v3061_v25 = vpop.f32.mrf.mxu1  ;;  %v1818_v61 = vadd.f32 %v2944_v9, %v1721_v46  ;;  %3166 = vmatpush3.bf16.msra.mxu1 %v3495_v1 }
 0x1c7   :  { %v2998_v48 = vpop.f32.mrf.mxu0  ;;  %3167 = vmatprep.subr.bf16.mxu1 %v3496_v43 }
 0x1c8   :  { %v1996_v27 = vadd.f32 %v3060_v28, %v1899_v33  ;;  %v2999_v15 = vadd.f32 %v2998_v48, %v2997_v20  ;;  %v3062_v30 = vpop.f32.mrf.mxu1 }
 0x1c9   :  { %v3000_v31 = vpop.f32.mrf.mxu0  ;;  %v3063_v47 = vadd.f32 %v3062_v30, %v3061_v25 }
 0x1ca   :  { %v3064_v0 = vpop.f32.mrf.mxu1  ;;  %v2020_v34 = vpack.c.bf16 %v1996_v27, %v1993_v26  ;;  %v1904_v37 = vadd.f32 %v2999_v15, %v3700_v58  ;;  %3168 = vmatpush3.bf16.msra.mxu1 %v3496_v43 }
 0x1cb   :  { %v3001_v35 = vpop.f32.mrf.mxu0 }
 0x1cc   :  { %v3002_v22 = vadd.f32 %v3001_v35, %v3000_v31  ;;  %v3065_v39 = vpop.f32.mrf.mxu1  ;;  %v2001_v3 = vadd.f32 %v3063_v47, %v1904_v37 }
 0x1cd   :  { %v3003_v41 = vpop.f32.mrf.mxu0  ;;  %v3066_v52 = vadd.f32 %v3065_v39, %v3064_v0 }
 0x1ce   :  { %v1907_v44 = vadd.f32 %v3002_v22, %v3703_v2  ;;  %v3067_v7 = vpop.f32.mrf.mxu1 }
 0x1cf   :  { %v3004_v45 = vpop.f32.mrf.mxu0 }
 0x1d0   :  { %v2004_v29 = vadd.f32 %v3066_v52, %v1907_v44  ;;  %v3005_v49 = vadd.f32 %v3004_v45, %v3003_v41  ;;  %v3068_v51 = vpop.f32.mrf.mxu1 }
 0x1d1   :  { %v3006_v53 = vpop.f32.mrf.mxu0  ;;  %v3069_v59 = vadd.f32 %v3068_v51, %v3067_v7 }
 0x1d2   :  { %v3070_v58 = vpop.f32.mrf.mxu1  ;;  %v2021_v11 = vpack.c.bf16 %v2004_v29, %v2001_v3  ;;  %v1912_v36 = vadd.f32 %v3005_v49, %v3712_v12  ;;  %v3754_v12 = vld [vmem:[#allocation2 + $0x10] sm:$0xff]  }
 0x1d3   :  { %v3007_v55 = vpop.f32.mrf.mxu0 }
 0x1d4   :  { %v3008_v2 = vadd.f32 %v3007_v55, %v3006_v53  ;;  %v3071_v13 = vpop.f32.mrf.mxu1  ;;  %v2009_v56 = vadd.f32 %v3069_v59, %v1912_v36 }
 0x1d5   :  { %v3072_v6 = vadd.f32 %v3071_v13, %v3070_v58 }
 0x1d6   :  { %v1915_v60 = vadd.f32 %v3008_v2, %v1818_v61 }
 0x1d8   :  { %v2012_v62 = vadd.f32 %v3072_v6, %v1915_v60 }
 0x1da   :  { %v2022_v24 = vpack.c.bf16 %v2012_v62, %v2009_v56 }
 0x1dc   :  { %3121 = vmatprep.subr.bf16.mxu0 %v2022_v24 }
 0x1dd   :  { %3122 = vmatpush3.bf16.msra.mxu0 %v2022_v24 }
 0x1de   :  { %3123 = vmatprep.subr.bf16.mxu0 %v2021_v11 }
 0x1e1   :  { %3124 = vmatpush3.bf16.msra.mxu0 %v2021_v11 }
 0x1e2   :  { %3125 = vmatprep.subr.bf16.mxu0 %v2020_v34 }
 0x1e5   :  { %3126 = vmatpush3.bf16.msra.mxu0 %v2020_v34 }
 0x1e6   :  { %3127 = vmatprep.subr.bf16.mxu0 %v2019_v40 }
 0x1e9   :  { %3128 = vmatpush3.bf16.msra.mxu0 %v2019_v40 }
 0x1ea   :  { %3129 = vmatprep.subr.bf16.mxu0 %v3730_v54 }
 0x1ed   :  { %3130 = vmatpush3.bf16.msra.mxu0 %v3730_v54  ;;  %v3760_v54 = vld [vmem:[#allocation2 + $0x20] sm:$0xff]  }
 0x1ee   :  { %3131 = vmatprep.subr.bf16.mxu0 %v3726_v42 }
 0x1f1   :  { %3132 = vmatpush3.bf16.msra.mxu0 %v3726_v42  ;;  %v3766_v42 = vld [vmem:[#allocation2 + $0x30] sm:$0xff]  }
 0x1f2   :  { %3133 = vmatprep.subr.bf16.mxu0 %v3723_v17 }
 0x1f5   :  { %3134 = vmatpush3.bf16.msra.mxu0 %v3723_v17  ;;  %v3764_v17 = vld [vmem:[#allocation2 + $0x28] sm:$0xff]  }
 0x1f6   :  { %3135 = vmatprep.subr.bf16.mxu0 %v3719_v16 }
 0x1f9   :  { %3136 = vmatpush3.bf16.msra.mxu0 %v3719_v16  ;;  %v3770_v16 = vld [vmem:[#allocation2 + $0x38] sm:$0xff]  }
 0x1fc   :  { %3138 = vmatmul.mubr.bf16.vlgmr.msra.gmra.mxu0 %v3751_v10 }
 0x1fd   :  { %3141 = vmatprep.mubr.bf16.mxu0 %v3754_v12 }
 0x204   :  { %3142 = vmatmul.mubr.bf16.gmra.mxu0 %v3758_v50 }
 0x205   :  { %3145 = vmatprep.mubr.bf16.mxu0 %v3760_v54 }
 0x20c   :  { %3146 = vmatmul.mubr.bf16.gmra.mxu0 %v3764_v17 }
 0x20d   :  { %3149 = vmatprep.mubr.bf16.mxu0 %v3766_v42 }
 0x214   :  { %3150 = vmatmul.mubr.bf16.gmra.mxu0 %v3770_v16 }
 0x215   :  { %3201 = vmatprep.mubr.bf16.mxu0 %v3684_v14 }
 0x2bc   :  { %v3139_v4 = vpop.f32.mrf.mxu0 }
 0x2bd   :  { %v2170_v19 = vmax.f32 %v3139_v4, 0.0 }
 0x2be   :  { %v2105_v23 = vpop.f32.mrf.mxu0 }
 0x2bf   :  { %v2168_v18 = vmax.f32 %v2105_v23, 0.0 }
 0x2c0   :  { %v3140_v5 = vpop.f32.mrf.mxu0 }
 0x2c1   :  { %v2171_v32 = vmax.f32 %v3140_v5, 0.0 }
 0x2c2   :  { %v2108_v40 = vpop.f32.mrf.mxu0 }
 0x2c3   :  { %v2169_v8 = vmax.f32 %v2108_v40, 0.0  ;;  %v2185_v14 = vpack.c.bf16 %v2171_v32, %v2170_v19 }
 0x2c4   :  { %v3143_v57 = vpop.f32.mrf.mxu0 }
 0x2c5   :  { %v2184_v20 = vpack.c.bf16 %v2169_v8, %v2168_v18  ;;  %v2174_v27 = vmax.f32 %v3143_v57, 0.0 }
 0x2c6   :  { %v2121_v21 = vpop.f32.mrf.mxu0 }
 0x2c7   :  { %3169 = vmatprep.mubr.bf16.mxu1 %v2184_v20  ;;  %v2172_v48 = vmax.f32 %v2121_v21, 0.0 }
 0x2c8   :  { %v3144_v33 = vpop.f32.mrf.mxu0  ;;  %3170 = vmatmul.mubr.bf16.vlgmr.msra.gmra.mxu1 %v2185_v14 }
 0x2c9   :  { %v2175_v28 = vmax.f32 %v3144_v33, 0.0 }
 0x2ca   :  { %v2124_v25 = vpop.f32.mrf.mxu0 }
 0x2cb   :  { %v2173_v26 = vmax.f32 %v2124_v25, 0.0  ;;  %v2187_v31 = vpack.c.bf16 %v2175_v28, %v2174_v27 }
 0x2cc   :  { %v3147_v15 = vpop.f32.mrf.mxu0 }
 0x2cd   :  { %v2186_v30 = vpack.c.bf16 %v2173_v26, %v2172_v48  ;;  %v2178_v39 = vmax.f32 %v3147_v15, 0.0 }
 0x2ce   :  { %v2137_v0 = vpop.f32.mrf.mxu0 }
 0x2cf   :  { %3173 = vmatprep.mubr.bf16.mxu1 %v2186_v30  ;;  %v2176_v37 = vmax.f32 %v2137_v0, 0.0 }
 0x2d0   :  { %v3148_v34 = vpop.f32.mrf.mxu0  ;;  %3174 = vmatmul.mubr.bf16.gmra.mxu1 %v2187_v31 }
 0x2d1   :  { %v2179_v35 = vmax.f32 %v3148_v34, 0.0 }
 0x2d2   :  { %v2140_v38 = vpop.f32.mrf.mxu0 }
 0x2d3   :  { %v2177_v22 = vmax.f32 %v2140_v38, 0.0  ;;  %v2189_v44 = vpack.c.bf16 %v2179_v35, %v2178_v39 }
 0x2d4   :  { %v3151_v41 = vpop.f32.mrf.mxu0 }
 0x2d5   :  { %v2188_v47 = vpack.c.bf16 %v2177_v22, %v2176_v37  ;;  %v2182_v49 = vmax.f32 %v3151_v41, 0.0 }
 0x2d6   :  { %v2153_v52 = vpop.f32.mrf.mxu0 }
 0x2d7   :  { %3177 = vmatprep.mubr.bf16.mxu1 %v2188_v47  ;;  %v2180_v3 = vmax.f32 %v2153_v52, 0.0 }
 0x2d8   :  { %v3152_v7 = vpop.f32.mrf.mxu0  ;;  %3178 = vmatmul.mubr.bf16.gmra.mxu1 %v2189_v44 }
 0x2d9   :  { %v2183_v45 = vmax.f32 %v3152_v7, 0.0 }
 0x2da   :  { %v2156_v46 = vpop.f32.mrf.mxu0 }
 0x2db   :  { %v2181_v29 = vmax.f32 %v2156_v46, 0.0  ;;  %v2191_v53 = vpack.c.bf16 %v2183_v45, %v2182_v49 }
 0x2dd   :  { %v2190_v51 = vpack.c.bf16 %v2181_v29, %v2180_v3 }
 0x2df   :  { %3181 = vmatprep.mubr.bf16.mxu1 %v2190_v51 }
 0x2e0   :  { %3182 = vmatmul.mubr.bf16.gmra.mxu1 %v2191_v53 }
 0x2e1   :  { %3209 = vmatprep.mubr.bf16.mxu1 %v3760_v54 }
 0x388   :  { %v3171_v9 = vpop.f32.mrf.mxu1 }
 0x38a   :  { %v2290_v58 = vpop.f32.mrf.mxu1 }
 0x38c   :  { %v3172_v11 = vpop.f32.mrf.mxu1 }
 0x38d   :  { %v2354_v40 = vpack.c.bf16 %v3172_v11, %v3171_v9 }
 0x38e   :  { %v2293_v55 = vpop.f32.mrf.mxu1 }
 0x38f   :  { %v2353_v18 = vpack.c.bf16 %v2293_v55, %v2290_v58 }
 0x390   :  { %v3175_v61 = vpop.f32.mrf.mxu1 }
 0x392   :  { %v2306_v36 = vpop.f32.mrf.mxu1 }
 0x394   :  { %v3176_v2 = vpop.f32.mrf.mxu1 }
 0x395   :  { %v2356_v5 = vpack.c.bf16 %v3176_v2, %v3175_v61 }
 0x396   :  { %v2309_v13 = vpop.f32.mrf.mxu1 }
 0x397   :  { %v2355_v32 = vpack.c.bf16 %v2309_v13, %v2306_v36 }
 0x398   :  { %v3179_v59 = vpop.f32.mrf.mxu1 }
 0x39a   :  { %v2322_v60 = vpop.f32.mrf.mxu1 }
 0x39c   :  { %v3180_v6 = vpop.f32.mrf.mxu1 }
 0x39d   :  { %v2358_v4 = vpack.c.bf16 %v3180_v6, %v3179_v59 }
 0x39e   :  { %v2325_v56 = vpop.f32.mrf.mxu1 }
 0x39f   :  { %v2357_v23 = vpack.c.bf16 %v2325_v56, %v2322_v60 }
 0x3a0   :  { %v3183_v62 = vpop.f32.mrf.mxu1 }
 0x3a2   :  { %v2338_v24 = vpop.f32.mrf.mxu1 }
 0x3a4   :  { %v3184_v63 = vpop.f32.mrf.mxu1 }
 0x3a5   :  { %v2360_v1 = vpack.c.bf16 %v3184_v63, %v3183_v62 }
 0x3a6   :  { %v2341_v43 = vpop.f32.mrf.mxu1 }
 0x3a7   :  { %3185 = vmatprep.subr.bf16.mxu0 %v2360_v1  ;;  %3217 = vmatprep.subr.bf16.mxu1 %v2360_v1  ;;  %v2359_v54 = vpack.c.bf16 %v2341_v43, %v2338_v24 }
 0x3a8   :  { %3186 = vmatpush3.bf16.msra.mxu0 %v2360_v1  ;;  %3225 = vmatpush3.bf16.msra.mxu1 %v2360_v1 }
 0x3a9   :  { %3187 = vmatprep.subr.bf16.mxu0 %v2359_v54  ;;  %3218 = vmatprep.subr.bf16.mxu1 %v2359_v54 }
 0x3ac   :  { %3188 = vmatpush3.bf16.msra.mxu0 %v2359_v54  ;;  %3226 = vmatpush3.bf16.msra.mxu1 %v2359_v54 }
 0x3ad   :  { %3189 = vmatprep.subr.bf16.mxu0 %v2358_v4  ;;  %3219 = vmatprep.subr.bf16.mxu1 %v2358_v4 }
 0x3b0   :  { %3190 = vmatpush3.bf16.msra.mxu0 %v2358_v4  ;;  %3227 = vmatpush3.bf16.msra.mxu1 %v2358_v4 }
 0x3b1   :  { %3191 = vmatprep.subr.bf16.mxu0 %v2357_v23  ;;  %3220 = vmatprep.subr.bf16.mxu1 %v2357_v23 }
 0x3b4   :  { %3192 = vmatpush3.bf16.msra.mxu0 %v2357_v23  ;;  %3228 = vmatpush3.bf16.msra.mxu1 %v2357_v23 }
 0x3b5   :  { %3193 = vmatprep.subr.bf16.mxu0 %v2356_v5  ;;  %3221 = vmatprep.subr.bf16.mxu1 %v2356_v5 }
 0x3b8   :  { %3194 = vmatpush3.bf16.msra.mxu0 %v2356_v5  ;;  %3229 = vmatpush3.bf16.msra.mxu1 %v2356_v5 }
 0x3b9   :  { %3195 = vmatprep.subr.bf16.mxu0 %v2355_v32  ;;  %3222 = vmatprep.subr.bf16.mxu1 %v2355_v32 }
 0x3bc   :  { %3196 = vmatpush3.bf16.msra.mxu0 %v2355_v32  ;;  %3230 = vmatpush3.bf16.msra.mxu1 %v2355_v32 }
 0x3bd   :  { %3197 = vmatprep.subr.bf16.mxu0 %v2354_v40  ;;  %3223 = vmatprep.subr.bf16.mxu1 %v2354_v40 }
 0x3c0   :  { %3198 = vmatpush3.bf16.msra.mxu0 %v2354_v40  ;;  %3231 = vmatpush3.bf16.msra.mxu1 %v2354_v40 }
 0x3c1   :  { %3199 = vmatprep.subr.bf16.mxu0 %v2353_v18  ;;  %3224 = vmatprep.subr.bf16.mxu1 %v2353_v18 }
 0x3c4   :  { %3200 = vmatpush3.bf16.msra.mxu0 %v2353_v18  ;;  %3232 = vmatpush3.bf16.msra.mxu1 %v2353_v18 }
 0x3c7   :  { %3202 = vmatmul.mubr.bf16.vlgmr.msra.gmra.mxu0 %v3751_v10  ;;  %3210 = vmatmul.mubr.bf16.vlgmr.msra.gmra.mxu1 %v3764_v17 }
 0x3c8   :  { %3205 = vmatprep.mubr.bf16.mxu0 %v3754_v12  ;;  %3213 = vmatprep.mubr.bf16.mxu1 %v3766_v42 }
 0x3cf   :  { %3206 = vmatmul.mubr.bf16.gmra.mxu0 %v3758_v50  ;;  %3214 = vmatmul.mubr.bf16.gmra.mxu1 %v3770_v16 }
 0x487   :  { %v3203_v8 = vpop.f32.mrf.mxu0  ;;  %v3211_v19 = vpop.f32.mrf.mxu1 }
 0x488   :  { %2460 = vst [vmem:[%s3833_s4 + $0x10] sm:$0xff] %v3203_v8  ;;  %2468 = vst [vmem:[%s3833_s4 + $0x50] sm:$0xff] %v3211_v19 }
 0x489   :  { %v2395_v10 = vpop.f32.mrf.mxu0  ;;  %v2427_v17 = vpop.f32.mrf.mxu1 }
 0x48a   :  { %2458 = vst [vmem:[%s3833_s4] sm:$0xff] %v2395_v10  ;;  %2466 = vst [vmem:[%s3833_s4 + $0x40] sm:$0xff] %v2427_v17 }
 0x48b   :  { %v3204_v12 = vpop.f32.mrf.mxu0  ;;  %v3212_v50 = vpop.f32.mrf.mxu1 }
 0x48c   :  { %2461 = vst [vmem:[%s3833_s4 + $0x18] sm:$0xff] %v3204_v12  ;;  %2469 = vst [vmem:[%s3833_s4 + $0x58] sm:$0xff] %v3212_v50 }
 0x48d   :  { %v2398_v42 = vpop.f32.mrf.mxu0  ;;  %v2430_v16 = vpop.f32.mrf.mxu1 }
 0x48e   :  { %2459 = vst [vmem:[%s3833_s4 + $0x8] sm:$0xff] %v2398_v42  ;;  %2467 = vst [vmem:[%s3833_s4 + $0x48] sm:$0xff] %v2430_v16 }
 0x48f   :  { %v3207_v57 = vpop.f32.mrf.mxu0  ;;  %v3215_v20 = vpop.f32.mrf.mxu1 }
 0x490   :  { %2464 = vst [vmem:[%s3833_s4 + $0x30] sm:$0xff] %v3207_v57  ;;  %2472 = vst [vmem:[%s3833_s4 + $0x70] sm:$0xff] %v3215_v20 }
 0x491   :  { %v2411_v14 = vpop.f32.mrf.mxu0  ;;  %v2443_v21 = vpop.f32.mrf.mxu1 }
 0x492   :  { %2462 = vst [vmem:[%s3833_s4 + $0x20] sm:$0xff] %v2411_v14  ;;  %2470 = vst [vmem:[%s3833_s4 + $0x60] sm:$0xff] %v2443_v21 }
 0x493   :  { %v3208_v33 = vpop.f32.mrf.mxu0  ;;  %v3216_v28 = vpop.f32.mrf.mxu1 }
 0x494   :  { %2465 = vst [vmem:[%s3833_s4 + $0x38] sm:$0xff] %v3208_v33  ;;  %2473 = vst [vmem:[%s3833_s4 + $0x78] sm:$0xff] %v3216_v28 }
 0x495   :  { %v2414_v25 = vpop.f32.mrf.mxu0  ;;  %v2446_v48 = vpop.f32.mrf.mxu1 }
 0x496   :  { %2463 = vst [vmem:[%s3833_s4 + $0x28] sm:$0xff] %v2414_v25  ;;  %2471 = vst [vmem:[%s3833_s4 + $0x68] sm:$0xff] %v2446_v48 }
 0x497   :  { %2478 = vsyncpa [#allocation3], 1 }
 0x498   :  { %2479 = vsyncpa [#allocation5], 1 }
 0x499   :  { %2480 = vsyncpa [#allocation8], 1 }

</bundles_post_ra>
